<compile_context>
chip_gen: v5e
topology: v5e:2x2
jax: 0.10.0
libtpu: 0.0.40
codegen_flags: <defaults>
</compile_context>

<pallas_src>
import functools

import jax
import jax.numpy as jnp
from jax import lax
from jax.experimental import pallas as pl
from jax.experimental.pallas import tpu as pltpu


def cross_attention_kernel(x_ref, cond_ref,
                           wq_ref, bq_ref,
                           wk_ref, bk_ref,
                           wv_ref, bv_ref,
                           wo_ref, bo_ref,
                           hsum_ref, hbcast_ref,
                           out_ref, *, s_valid):
    TB, Din = x_ref.shape              # batch tile, model dim (= H * Dh)
    BS, _ = cond_ref.shape             # TB * S_pad rows of the flattened condition
    S = BS // TB                       # padded sequence length (multiple of 8)
    H = hsum_ref.shape[1]
    Dh = Din // H

    x = x_ref[...]                     # (TB, Din)       bf16
    cond = cond_ref[...]               # (TB*S, Dc)      bf16

    # --- projections (MXU, bf16 x bf16 -> f32 accumulate); K and V as separate
    # dots against the resident cond tile (no mid-lane-tile slice) ---
    q = jnp.dot(x, wq_ref[...], preferred_element_type=jnp.float32) + bq_ref[...]   # (TB, Din)
    k = (jnp.dot(cond, wk_ref[...], preferred_element_type=jnp.float32)
         + bk_ref[...]).reshape(TB, S, Din)                                         # (TB, S, Din)
    v = (jnp.dot(cond, wv_ref[...], preferred_element_type=jnp.float32)
         + bv_ref[...]).reshape(TB, S, Din)                                         # (TB, S, Din)

    inv_scale = jnp.float32(1.0 / (Dh ** 0.5))     # PyTorch divides by sqrt(head_dim)

    # --- fused all-heads attention (query length == 1) ---
    # scores[b, s, h] = sum_d q[b, h*Dh + d] * k[b, s, h*Dh + d]
    p = (q[:, None, :] * k).reshape(TB * S, Din)                                    # f32
    scores = jnp.dot(p.astype(jnp.bfloat16), hsum_ref[...],
                     preferred_element_type=jnp.float32)
    scores = scores.reshape(TB, S, H) * inv_scale                                   # (TB, S, H)

    if s_valid < S:
        # Mask zero-padded condition rows (wrapper padded S up to a sublane multiple).
        s_idx = lax.broadcasted_iota(jnp.int32, (TB, S, H), 1)
        scores = jnp.where(s_idx < s_valid, scores, jnp.float32(-1e30))

    m = jnp.max(scores, axis=1, keepdims=True)                                      # (TB, 1, H)
    e = jnp.exp(scores - m)
    denom = jnp.sum(e, axis=1, keepdims=True)
    w = e * pl.reciprocal(denom, approx=True)       # softmax over S (EUP reciprocal)

    # Broadcast per-head weights back to the Din lanes, reduce over S.
    w_full = jnp.dot(w.reshape(TB * S, H).astype(jnp.bfloat16), hbcast_ref[...],
                     preferred_element_type=jnp.float32).reshape(TB, S, Din)
    attn = jnp.sum(w_full * v, axis=1)                                              # (TB, Din) f32

    # --- output projection (init gate pre-folded into Wo in the wrapper) ---
    out_ref[...] = (jnp.dot(attn.astype(wo_ref.dtype), wo_ref[...],
                            preferred_element_type=jnp.float32)
                    + bo_ref[...]).astype(out_ref.dtype)


def _lane_pad(d):
    return ((d + 127) // 128) * 128


def _estimate_vmem_bytes(bb, s, din, dc, h, out_bytes):
    """Rough per-step VMEM working-set estimate (lane-padded, double-buffered I/O)."""
    streamed = 2 * bb * (_lane_pad(din) * 2            # x tile (bf16)
                         + s * _lane_pad(dc) * 2       # condition tile (bf16)
                         + _lane_pad(din) * out_bytes)  # output tile
    interm = bb * s * (5 * _lane_pad(din) + 3 * _lane_pad(h)) * 4 \
        + 4 * bb * _lane_pad(din) * 4                  # f32 intermediates (k,v,p,w_full,...)
    weights = 4 * max(din, dc, 8) * _lane_pad(din) * 2 + 6 * 8 * _lane_pad(din) * 4
    return streamed + interm + weights


def _pick_block_b(B, s, din, dc, h, out_bytes, budget_bytes):
    # Largest sublane-aligned divisor of B that fits the budget; prefer >= 2 grid
    # steps so the "parallel" axis actually shards across both v7x TensorCores.
    cands = [d for d in range(B, 0, -1) if B % d == 0 and (d % 8 == 0 or d == B)]
    fitting = [d for d in cands
               if _estimate_vmem_bytes(d, s, din, dc, h, out_bytes) <= budget_bytes]
    if not fitting:
        fitting = [cands[-1]]
    multi = [d for d in fitting if B // d >= 2]
    return multi[0] if multi else fitting[0]


def cross_attention(x, condition, params, num_heads, *, block_b=None,
                    out_dtype=jnp.float32):
    B, Din = x.shape
    Bc, S, Dc = condition.shape
    assert Bc == B and Din % num_heads == 0
    H = num_heads
    Dh = Din // H

    f32, bf16 = jnp.float32, jnp.bfloat16

    # Pad S up to a sublane multiple so in-kernel reshapes are layout-free;
    # padded positions are masked to -inf before the softmax.
    S_pad = ((S + 7) // 8) * 8
    cond = condition
    if S_pad != S:
        cond = jnp.pad(condition, ((0, 0), (0, S_pad - S), (0, 0)))

    if block_b is None:
        block_b = _pick_block_b(B, S_pad, Din, Dc, H,
                                jnp.dtype(out_dtype).itemsize,
                                budget_bytes=40 * 1024 * 1024)
    assert B % block_b == 0, "batch must be divisible by the batch tile"
    grid = (B // block_b,)

    # Wrapper-side layout plumbing: flatten condition, cast MXU operands to bf16
    # (accumulation stays f32 inside the kernel), fold the init gate into Wo.
    cond2d = cond.reshape(B * S_pad, Dc).astype(bf16)
    x_bf = x.astype(bf16)
    init_scalar = params["init"].reshape(()).astype(f32)

    wq = params["wq"].astype(bf16)
    wk = params["wk"].astype(bf16)
    wv = params["wv"].astype(bf16)
    wo = (params["wo"].astype(f32) * init_scalar).astype(bf16)   # attn*init @ Wo == attn @ (init*Wo)
    bq = params["bq"].astype(f32)
    bk = params["bk"].astype(f32)
    bv = params["bv"].astype(f32)
    bo = params["bo"].astype(f32)

    # Block-diagonal head-sum (Din, H) and head-broadcast (H, Din) matrices (exact in bf16).
    head_of_lane = jnp.arange(Din, dtype=jnp.int32) // Dh
    hsum = (head_of_lane[:, None] == jnp.arange(H, dtype=jnp.int32)[None, :]).astype(bf16)
    hbcast = hsum.T

    def resident(shape):
        # Same block index at every grid step -> stays VMEM-resident (no re-DMA).
        return pl.BlockSpec(shape, lambda i: (0, 0))

    kernel = functools.partial(cross_attention_kernel, s_valid=S)

    return pl.pallas_call(
        kernel,
        out_shape=jax.ShapeDtypeStruct((B, Din), out_dtype),
        grid=grid,
        in_specs=[
            pl.BlockSpec((block_b, Din), lambda i: (i, 0)),           # x tile
            pl.BlockSpec((block_b * S_pad, Dc), lambda i: (i, 0)),    # condition tile (flattened)
            resident((Din, Din)), resident((1, Din)),                 # Wq, bq
            resident((Dc, Din)), resident((1, Din)),                  # Wk, bk
            resident((Dc, Din)), resident((1, Din)),                  # Wv, bv
            resident((Din, Din)), resident((1, Din)),                 # init*Wo, bo
            resident((Din, H)), resident((H, Din)),                   # head-sum / head-broadcast
        ],
        out_specs=pl.BlockSpec((block_b, Din), lambda i: (i, 0)),
        compiler_params=pltpu.CompilerParams(
            dimension_semantics=("parallel",),        # batch tiles independent; megacore on v7x
            vmem_limit_bytes=48 * 1024 * 1024,        # under v7x's 64 MiB physical VMEM
        ),
    )(x_bf, cond2d, wq, bq, wk, bk, wv, bv, wo, bo, hsum, hbcast)


def cross_attention_reference(x, condition, params, num_heads):
    """Pure-JAX (f32) port of the PyTorch forward, used to verify the kernel."""
    B, Din = x.shape
    _, S, Dc = condition.shape
    H = num_heads
    Dh = Din // H
    q = x @ params["wq"] + params["bq"][0]
    k = condition.reshape(B * S, Dc) @ params["wk"] + params["bk"][0]
    v = condition.reshape(B * S, Dc) @ params["wv"] + params["bv"][0]
    q = q.reshape(B, 1, H, Dh).transpose(0, 2, 1, 3)   # (B, H, 1, Dh)
    k = k.reshape(B, S, H, Dh).transpose(0, 2, 1, 3)   # (B, H, S, Dh)
    v = v.reshape(B, S, H, Dh).transpose(0, 2, 1, 3)
    scores = jnp.einsum("bhqd,bhkd->bhqk", q, k) / jnp.sqrt(jnp.float32(Dh))
    w = jax.nn.softmax(scores, axis=-1)
    o = jnp.einsum("bhqk,bhkd->bhqd", w, v)            # (B, H, 1, Dh)
    o = o.transpose(0, 2, 1, 3).reshape(B, H * Dh)
    o = o * params["init"][0]
    return o @ params["wo"] + params["bo"][0]


if __name__ == "__main__":
    B = 32
    INPUT_DIM = 32       # must be divisible by num_heads
    COND_DIM = 16
    NUM_HEADS = 4
    S = 8                # condition sequence length

    key = jax.random.PRNGKey(0)
    ks = jax.random.split(key, 10)

    x = jax.random.normal(ks[0], (B, INPUT_DIM), dtype=jnp.float32)
    condition = jax.random.normal(ks[1], (B, S, COND_DIM), dtype=jnp.float32)

    def lin(kw, kb, din, dout):
        w = jax.random.normal(kw, (din, dout), dtype=jnp.float32) * 0.1
        b = jax.random.normal(kb, (1, dout), dtype=jnp.float32) * 0.1
        return w, b

    wq, bq = lin(ks[2], ks[3], INPUT_DIM, INPUT_DIM)
    wk, bk = lin(ks[4], ks[5], COND_DIM, INPUT_DIM)
    wv, bv = lin(ks[6], ks[7], COND_DIM, INPUT_DIM)
    wo, bo = lin(ks[8], ks[9], INPUT_DIM, INPUT_DIM)

    # The module initializes `init` to 0 (output would reduce to out.bias); use a
    # nonzero deterministic value so the attention path is numerically exercised.
    init = jnp.array([0.5], dtype=jnp.float32)

    params = dict(wq=wq, bq=bq, wk=wk, bk=bk, wv=wv, bv=bv, wo=wo, bo=bo, init=init)

    # block_b heuristic picks 16 here (largest VMEM-fitting tile with >=2 grid steps,
    # so the "parallel" axis can shard across both v7x TensorCores).
    out = cross_attention(x, condition, params, NUM_HEADS)
    out = jax.block_until_ready(out)

    ref = cross_attention_reference(x, condition, params, NUM_HEADS)
    assert out.shape == (B, INPUT_DIM)
    # bf16 MXU operands (incl. the score / weight head matmuls) + approx reciprocal
    # -> tolerance loosened vs the f32 reference.
    assert jnp.allclose(out, ref, atol=3e-2, rtol=3e-2), (
        f"max abs err {jnp.max(jnp.abs(out - ref))}")

    print("KERNEL_OK")
</pallas_src>

<mosaic_0001>
module attributes {stable_mosaic.version = 11 : i64} {
  func.func @cross_attention_kernel(%arg0: i32, %arg1: memref<16x32xbf16, #tpu.memory_space<vmem>>, %arg2: memref<128x16xbf16, #tpu.memory_space<vmem>>, %arg3: memref<32x32xbf16, #tpu.memory_space<vmem>>, %arg4: memref<1x32xf32, #tpu.memory_space<vmem>>, %arg5: memref<16x32xbf16, #tpu.memory_space<vmem>>, %arg6: memref<1x32xf32, #tpu.memory_space<vmem>>, %arg7: memref<16x32xbf16, #tpu.memory_space<vmem>>, %arg8: memref<1x32xf32, #tpu.memory_space<vmem>>, %arg9: memref<32x32xbf16, #tpu.memory_space<vmem>>, %arg10: memref<1x32xf32, #tpu.memory_space<vmem>>, %arg11: memref<32x4xbf16, #tpu.memory_space<vmem>>, %arg12: memref<4x32xbf16, #tpu.memory_space<vmem>>, %arg13: memref<16x32xf32, #tpu.memory_space<vmem>>) attributes {dimension_semantics = [#tpu.dimension_semantics<parallel>], iteration_bounds = array<i64: 2>, scalar_prefetch = 0 : i64, scratch_operands = 0 : i64, tpu.core_type = #tpu.core_type<tc>, window_params = [{transform_indices = @transform_0, window_bounds = array<i64: 16, 32>}, {transform_indices = @transform_1, window_bounds = array<i64: 128, 16>}, {pipeline_mode = #tpu.pipeline_mode<synchronous>, transform_indices = @transform_2, window_bounds = array<i64: 32, 32>}, {pipeline_mode = #tpu.pipeline_mode<synchronous>, transform_indices = @transform_3, window_bounds = array<i64: 1, 32>}, {pipeline_mode = #tpu.pipeline_mode<synchronous>, transform_indices = @transform_4, window_bounds = array<i64: 16, 32>}, {pipeline_mode = #tpu.pipeline_mode<synchronous>, transform_indices = @transform_5, window_bounds = array<i64: 1, 32>}, {pipeline_mode = #tpu.pipeline_mode<synchronous>, transform_indices = @transform_6, window_bounds = array<i64: 16, 32>}, {pipeline_mode = #tpu.pipeline_mode<synchronous>, transform_indices = @transform_7, window_bounds = array<i64: 1, 32>}, {pipeline_mode = #tpu.pipeline_mode<synchronous>, transform_indices = @transform_8, window_bounds = array<i64: 32, 32>}, {pipeline_mode = #tpu.pipeline_mode<synchronous>, transform_indices = @transform_9, window_bounds = array<i64: 1, 32>}, {pipeline_mode = #tpu.pipeline_mode<synchronous>, transform_indices = @transform_10, window_bounds = array<i64: 32, 4>}, {pipeline_mode = #tpu.pipeline_mode<synchronous>, transform_indices = @transform_11, window_bounds = array<i64: 4, 32>}, {transform_indices = @transform_12, window_bounds = array<i64: 16, 32>}]} {
    %c0 = arith.constant 0 : index
    %c0_0 = arith.constant 0 : index
    %0 = vector.load %arg1[%c0, %c0_0] : memref<16x32xbf16, #tpu.memory_space<vmem>>, vector<16x32xbf16>
    %c0_1 = arith.constant 0 : index
    %c0_2 = arith.constant 0 : index
    %1 = vector.load %arg2[%c0_1, %c0_2] : memref<128x16xbf16, #tpu.memory_space<vmem>>, vector<128x16xbf16>
    %c0_3 = arith.constant 0 : index
    %c0_4 = arith.constant 0 : index
    %2 = vector.load %arg3[%c0_3, %c0_4] : memref<32x32xbf16, #tpu.memory_space<vmem>>, vector<32x32xbf16>
    %cst = arith.constant dense<0.000000e+00> : vector<16x32xf32>
    %3 = tpu.matmul %0, %2, %cst {dimension_numbers = #tpu.dot_dimension_numbers<[1], [0], [0], [1], [0, 0, 1, 1], [], []>} : vector<16x32xbf16>, vector<32x32xbf16>, vector<16x32xf32> -> vector<16x32xf32>
    %c0_5 = arith.constant 0 : index
    %c0_6 = arith.constant 0 : index
    %4 = vector.load %arg4[%c0_5, %c0_6] : memref<1x32xf32, #tpu.memory_space<vmem>>, vector<1x32xf32>
    %5 = vector.broadcast %4 : vector<1x32xf32> to vector<16x32xf32>
    %6 = arith.addf %3, %5 : vector<16x32xf32>
    %c0_7 = arith.constant 0 : index
    %c0_8 = arith.constant 0 : index
    %7 = vector.load %arg5[%c0_7, %c0_8] : memref<16x32xbf16, #tpu.memory_space<vmem>>, vector<16x32xbf16>
    %cst_9 = arith.constant dense<0.000000e+00> : vector<128x32xf32>
    %8 = tpu.matmul %1, %7, %cst_9 {dimension_numbers = #tpu.dot_dimension_numbers<[1], [0], [0], [1], [0, 0, 1, 1], [], []>} : vector<128x16xbf16>, vector<16x32xbf16>, vector<128x32xf32> -> vector<128x32xf32>
    %c0_10 = arith.constant 0 : index
    %c0_11 = arith.constant 0 : index
    %9 = vector.load %arg6[%c0_10, %c0_11] : memref<1x32xf32, #tpu.memory_space<vmem>>, vector<1x32xf32>
    %10 = vector.broadcast %9 : vector<1x32xf32> to vector<128x32xf32>
    %11 = arith.addf %8, %10 : vector<128x32xf32>
    %12 = vector.shape_cast %11 : vector<128x32xf32> to vector<16x8x32xf32>
    %c0_12 = arith.constant 0 : index
    %c0_13 = arith.constant 0 : index
    %13 = vector.load %arg7[%c0_12, %c0_13] : memref<16x32xbf16, #tpu.memory_space<vmem>>, vector<16x32xbf16>
    %cst_14 = arith.constant dense<0.000000e+00> : vector<128x32xf32>
    %14 = tpu.matmul %1, %13, %cst_14 {dimension_numbers = #tpu.dot_dimension_numbers<[1], [0], [0], [1], [0, 0, 1, 1], [], []>} : vector<128x16xbf16>, vector<16x32xbf16>, vector<128x32xf32> -> vector<128x32xf32>
    %c0_15 = arith.constant 0 : index
    %c0_16 = arith.constant 0 : index
    %15 = vector.load %arg8[%c0_15, %c0_16] : memref<1x32xf32, #tpu.memory_space<vmem>>, vector<1x32xf32>
    %16 = vector.broadcast %15 : vector<1x32xf32> to vector<128x32xf32>
    %17 = arith.addf %14, %16 : vector<128x32xf32>
    %18 = vector.shape_cast %17 : vector<128x32xf32> to vector<16x8x32xf32>
    %19 = vector.shape_cast %6 : vector<16x32xf32> to vector<16x1x32xf32>
    %20 = vector.broadcast %19 : vector<16x1x32xf32> to vector<16x8x32xf32>
    %21 = arith.mulf %20, %12 : vector<16x8x32xf32>
    %22 = vector.shape_cast %21 : vector<16x8x32xf32> to vector<128x32xf32>
    %23 = arith.truncf %22 : vector<128x32xf32> to vector<128x32xbf16>
    %c0_17 = arith.constant 0 : index
    %c0_18 = arith.constant 0 : index
    %24 = vector.load %arg11[%c0_17, %c0_18] : memref<32x4xbf16, #tpu.memory_space<vmem>>, vector<32x4xbf16>
    %cst_19 = arith.constant dense<0.000000e+00> : vector<128x4xf32>
    %25 = tpu.matmul %23, %24, %cst_19 {dimension_numbers = #tpu.dot_dimension_numbers<[1], [0], [0], [1], [0, 0, 1, 1], [], []>} : vector<128x32xbf16>, vector<32x4xbf16>, vector<128x4xf32> -> vector<128x4xf32>
    %26 = vector.shape_cast %25 : vector<128x4xf32> to vector<16x8x4xf32>
    %cst_20 = arith.constant 0.353553385 : f32
    %27 = vector.broadcast %cst_20 : f32 to vector<16x8x4xf32>
    %28 = arith.mulf %26, %27 : vector<16x8x4xf32>
    %cst_21 = arith.constant dense<0xFF800000> : vector<16x4xf32>
    %29 = vector.multi_reduction <maximumf>, %28, %cst_21 [1] : vector<16x8x4xf32> to vector<16x4xf32>
    %30 = vector.shape_cast %29 : vector<16x4xf32> to vector<16x1x4xf32>
    %31 = vector.broadcast %30 : vector<16x1x4xf32> to vector<16x8x4xf32>
    %32 = arith.subf %28, %31 : vector<16x8x4xf32>
    %33 = math.exp %32 : vector<16x8x4xf32>
    %cst_22 = arith.constant dense<0.000000e+00> : vector<16x4xf32>
    %34 = vector.multi_reduction <add>, %33, %cst_22 [1] : vector<16x8x4xf32> to vector<16x4xf32>
    %35 = vector.shape_cast %34 : vector<16x4xf32> to vector<16x1x4xf32>
    %36 = tpu.reciprocal %35 {approx = true} : vector<16x1x4xf32> -> vector<16x1x4xf32>
    %37 = vector.broadcast %36 : vector<16x1x4xf32> to vector<16x8x4xf32>
    %38 = arith.mulf %33, %37 : vector<16x8x4xf32>
    %39 = vector.shape_cast %38 : vector<16x8x4xf32> to vector<128x4xf32>
    %40 = arith.truncf %39 : vector<128x4xf32> to vector<128x4xbf16>
    %c0_23 = arith.constant 0 : index
    %c0_24 = arith.constant 0 : index
    %41 = vector.load %arg12[%c0_23, %c0_24] : memref<4x32xbf16, #tpu.memory_space<vmem>>, vector<4x32xbf16>
    %cst_25 = arith.constant dense<0.000000e+00> : vector<128x32xf32>
    %42 = tpu.matmul %40, %41, %cst_25 {dimension_numbers = #tpu.dot_dimension_numbers<[1], [0], [0], [1], [0, 0, 1, 1], [], []>} : vector<128x4xbf16>, vector<4x32xbf16>, vector<128x32xf32> -> vector<128x32xf32>
    %43 = vector.shape_cast %42 : vector<128x32xf32> to vector<16x8x32xf32>
    %44 = arith.mulf %43, %18 : vector<16x8x32xf32>
    %cst_26 = arith.constant dense<0.000000e+00> : vector<16x32xf32>
    %45 = vector.multi_reduction <add>, %44, %cst_26 [1] : vector<16x8x32xf32> to vector<16x32xf32>
    %46 = arith.truncf %45 : vector<16x32xf32> to vector<16x32xbf16>
    %c0_27 = arith.constant 0 : index
    %c0_28 = arith.constant 0 : index
    %47 = vector.load %arg9[%c0_27, %c0_28] : memref<32x32xbf16, #tpu.memory_space<vmem>>, vector<32x32xbf16>
    %cst_29 = arith.constant dense<0.000000e+00> : vector<16x32xf32>
    %48 = tpu.matmul %46, %47, %cst_29 {dimension_numbers = #tpu.dot_dimension_numbers<[1], [0], [0], [1], [0, 0, 1, 1], [], []>} : vector<16x32xbf16>, vector<32x32xbf16>, vector<16x32xf32> -> vector<16x32xf32>
    %c0_30 = arith.constant 0 : index
    %c0_31 = arith.constant 0 : index
    %49 = vector.load %arg10[%c0_30, %c0_31] : memref<1x32xf32, #tpu.memory_space<vmem>>, vector<1x32xf32>
    %50 = vector.broadcast %49 : vector<1x32xf32> to vector<16x32xf32>
    %51 = arith.addf %48, %50 : vector<16x32xf32>
    %c0_32 = arith.constant 0 : index
    %c0_33 = arith.constant 0 : index
    %52 = vector.load %arg13[%c0_32, %c0_33] : memref<16x32xf32, #tpu.memory_space<vmem>>, vector<16x32xf32>
    tpu.vector_store %arg13[%c0_32, %c0_33], %51 {strides = array<i32>} : memref<16x32xf32, #tpu.memory_space<vmem>>, vector<16x32xf32>,
    return
  }
  func.func @transform_0(%arg0: i32) -> (i32, i32) {
    %c0_i32 = arith.constant 0 : i32
    %c0_i32_0 = arith.constant 0 : i32
    return %arg0, %c0_i32 : i32, i32
  }
  func.func @transform_1(%arg0: i32) -> (i32, i32) {
    %c0_i32 = arith.constant 0 : i32
    %c0_i32_0 = arith.constant 0 : i32
    return %arg0, %c0_i32 : i32, i32
  }
  func.func @transform_2(%arg0: i32) -> (i32, i32) {
    %c0_i32 = arith.constant 0 : i32
    %c0_i32_0 = arith.constant 0 : i32
    %c0_i32_1 = arith.constant 0 : i32
    return %c0_i32, %c0_i32_0 : i32, i32
  }
  func.func @transform_3(%arg0: i32) -> (i32, i32) {
    %c0_i32 = arith.constant 0 : i32
    %c0_i32_0 = arith.constant 0 : i32
    %c0_i32_1 = arith.constant 0 : i32
    return %c0_i32, %c0_i32_0 : i32, i32
  }
  func.func @transform_4(%arg0: i32) -> (i32, i32) {
    %c0_i32 = arith.constant 0 : i32
    %c0_i32_0 = arith.constant 0 : i32
    %c0_i32_1 = arith.constant 0 : i32
    return %c0_i32, %c0_i32_0 : i32, i32
  }
  func.func @transform_5(%arg0: i32) -> (i32, i32) {
    %c0_i32 = arith.constant 0 : i32
    %c0_i32_0 = arith.constant 0 : i32
    %c0_i32_1 = arith.constant 0 : i32
    return %c0_i32, %c0_i32_0 : i32, i32
  }
  func.func @transform_6(%arg0: i32) -> (i32, i32) {
    %c0_i32 = arith.constant 0 : i32
    %c0_i32_0 = arith.constant 0 : i32
    %c0_i32_1 = arith.constant 0 : i32
    return %c0_i32, %c0_i32_0 : i32, i32
  }
  func.func @transform_7(%arg0: i32) -> (i32, i32) {
    %c0_i32 = arith.constant 0 : i32
    %c0_i32_0 = arith.constant 0 : i32
    %c0_i32_1 = arith.constant 0 : i32
    return %c0_i32, %c0_i32_0 : i32, i32
  }
  func.func @transform_8(%arg0: i32) -> (i32, i32) {
    %c0_i32 = arith.constant 0 : i32
    %c0_i32_0 = arith.constant 0 : i32
    %c0_i32_1 = arith.constant 0 : i32
    return %c0_i32, %c0_i32_0 : i32, i32
  }
  func.func @transform_9(%arg0: i32) -> (i32, i32) {
    %c0_i32 = arith.constant 0 : i32
    %c0_i32_0 = arith.constant 0 : i32
    %c0_i32_1 = arith.constant 0 : i32
    return %c0_i32, %c0_i32_0 : i32, i32
  }
  func.func @transform_10(%arg0: i32) -> (i32, i32) {
    %c0_i32 = arith.constant 0 : i32
    %c0_i32_0 = arith.constant 0 : i32
    %c0_i32_1 = arith.constant 0 : i32
    return %c0_i32, %c0_i32_0 : i32, i32
  }
  func.func @transform_11(%arg0: i32) -> (i32, i32) {
    %c0_i32 = arith.constant 0 : i32
    %c0_i32_0 = arith.constant 0 : i32
    %c0_i32_1 = arith.constant 0 : i32
    return %c0_i32, %c0_i32_0 : i32, i32
  }
  func.func @transform_12(%arg0: i32) -> (i32, i32) {
    %c0_i32 = arith.constant 0 : i32
    %c0_i32_0 = arith.constant 0 : i32
    return %arg0, %c0_i32 : i32, i32
  }
}

</mosaic_0001>

<bundles_post_ra>
// kernel: tpu_custom_call.1
= control target key start
LH: loop header
LB: loop body
LE: loop exit
PB: predicated region body
PF: predicated region fallthrough
CT: control target
= control target key end

     0   :  { %s2298_s0 = inlined_call_operand.vmem [shape: bf16[32,32], index: 0, kind: input, shape index: {}]   ;;  %s2299_s1 = inlined_call_operand.vmem [shape: bf16[256,16], index: 1, kind: input, shape index: {}]   ;;  %s2300_s2 = inlined_call_operand.vmem [shape: bf16[32,32], index: 2, kind: input, shape index: {}]   ;;  %s2301_s3 = inlined_call_operand.vmem [shape: f32[1,32], index: 3, kind: input, shape index: {}]   ;;  %s2302_s4 = inlined_call_operand.vmem [shape: bf16[16,32], index: 4, kind: input, shape index: {}]   ;;  %s2303_s5 = inlined_call_operand.vmem [shape: f32[1,32], index: 5, kind: input, shape index: {}]   ;;  %s2304_s6 = inlined_call_operand.vmem [shape: bf16[16,32], index: 6, kind: input, shape index: {}]   ;;  %s2305_s7 = inlined_call_operand.vmem [shape: f32[1,32], index: 7, kind: input, shape index: {}]   ;;  %s2306_s8 = inlined_call_operand.vmem [shape: bf16[32,32], index: 8, kind: input, shape index: {}]   ;;  %s2307_s9 = inlined_call_operand.vmem [shape: f32[1,32], index: 9, kind: input, shape index: {}]   ;;  %s2308_s10 = inlined_call_operand.vmem [shape: bf16[32,4], index: 10, kind: input, shape index: {}]   ;;  %s2309_s11 = inlined_call_operand.vmem [shape: bf16[4,32], index: 11, kind: input, shape index: {}]   ;;  %s2310_s12 = inlined_call_operand.hbm [shape: f32[32,32], index: 12, kind: output, shape index: {}]  }
   0x1   :  { %2311 = sst [smem:[#allocation5_spill]] %s2298_s0 }
   0x2   :  { %2312 = sst [smem:[#allocation6_spill]] %s2302_s4 }
   0x3   :  { %17 = vsyncpa [#allocation3], 0 }
   0x4   :  { %19 = vsyncpa [#allocation3 + $0x1], 0  ;;  %s1955_s21 = smov 0   ;;  %s1957_s22 = smov 0  }
   0x5   :  { %s1959_s23 = smov 0   ;;  %s1961_s24 = smov 0  }
   0x6 LB: > { %s1580_s25 = sadd.s32 4294967295, %s1886_s24   ;;  %s1581_s26 = sadd.s32 4294967294, %s1886_s24   ;;  %s1886_s24 = sphi %s1961_s24, %s2320_s24   ;;  %s1882_s23 = sphi %s1959_s23, %s2319_s23   ;;  %s1878_s22 = sphi %s1957_s22, %s2318_s22   ;;  %s1874_s21 = sphi %s1955_s21, %s2317_s21  }
   0x7   : > { %s1978_s27 = sadd.s32 1, %s1886_s24   ;;  %s294_s28 = sadd.s32 1, %s1882_s23 }
   0x8   : > { %s291_s29 = ssub.s32 %s1886_s24, %s1978_s27  ;;  %p304_p0 = scmp.ne.s32.totalorder %s1882_s23, %s1878_s22 }
   0x9   : > { %p292_p1 = scmp.eq.s32.totalorder %s291_s29, 0  ;;  %p305_p2 = scmp.eq.s32.totalorder %s1580_s25, 1 }
   0xa   : > { %p310_p3 = scmp.ne.s32.totalorder %s1878_s22, %s1874_s21  ;;  %p311_p4 = scmp.eq.s32.totalorder %s1581_s26, 1 }
   0xb   : > { %s1988_s30 = scalar_select %p292_p1, %s1882_s23, %s294_s28  }
   0xc   : > { %p1990_p5 = por %p305_p2, %p304_p0  ;;  %p1994_p6 = por %p311_p4, %p310_p3 }
   0xd   : > { %p1584_p7 = scmp.ge.s32.totalorder %s1886_s24, 1  ;;  %p377_p8 = scmp.lt.s32.totalorder %s1886_s24, 3 }
   0xf   : > { %p378_p9 = pnand %p1584_p7, %p377_p8 }
  0x10   : > { %s2315_s4 = sld [smem:[#allocation6_spill]] (!%p378_p9)  ;;  %s1586_s19 = sshll.u32 (!%p378_p9), %s1580_s25, 1 }
  0x11   : > { %381 = sbr.rel (%p378_p9) target bundleno = 767 (0x2ff), region = 68  ;;  %s2006_s20 = sshll.u32 (!%p378_p9), %s1580_s25, 4 }
  0x12   : > { %p425_p10 = scmp.lt.s32.totalorder (!%p378_p9), %s1586_s19, 3  ;;  %p431_p11 = scmp.lt.s32.totalorder (!%p378_p9), %s2006_s20, 31 }
  0x13   : > { %s2316_s0 = sld [smem:[#allocation5_spill]] (!%p378_p9)  ;;  %s421_s26 = sand.u32 (!%p378_p9), 1, %s1878_s22  }
  0x14   : > { %s1503_s16 = scalar_lea.hbm (!%p378_p9), %s2310_s12, %s2006_s20 }
  0x16   : > { %v1707_v0 = vld [vmem:[%s2300_s2 + $0x8] sm:$0xff]  ;;  %v1708_v1 = vld [vmem:[%s2315_s4] sm:$0xff]  ;;  %s2322_s19 = smov (!%p425_p10, %s1586_s19), 3  ;;  %vm481_vm0 = vcmask 261120   ;;  %vm551_vm1 = vcmask 130048   ;;  %vm863_vm2 = vcmask 31744  }
  0x17   : > { %v1706_v2 = vld [vmem:[%s2300_s2] sm:$0xff]  ;;  %491 = vmatpush.bf16.msra.mxu0 %v1707_v0  ;;  %583 = vmatpush.bf16.msra.mxu1 %v1708_v1  ;;  %s432_s29 = scalar_select %p431_p11, %s2006_s20, 31  ;;  %v1711_v11 = vld [vmem:[%s2308_s10 + $0x8] sm:$0xff]  ;;  %vm1201_vm3 = vcmask 1041408   ;;  %vm1438_vm4 = vcmask 1041409   ;;  %vm1440_vm5 = vcmask 1042434  }
  0x18   : > { %s1587_s15 = sshll.u32 %s2322_s19, 2  ;;  %804 = vmatpush.bf16.msra.mxu3 %v1711_v11  ;;  %v1710_v12 = vld [vmem:[%s2308_s10] sm:$0xff]  ;;  %vm1442_vm6 = vcmask 1043459   ;;  %vm1444_vm7 = vcmask 1044484   ;;  %vm1446_vm8 = vcmask 1045509   ;;  %vm1448_vm9 = vcmask 1046534  }
  0x19   : > { %s428_s18 = scalar_lea.vmem %s2316_s0, %s1587_s15  ;;  %s1589_s25 = sshll.u32 %s432_s29, 2  ;;  %v1756_v14 = vld [vmem:[%s2301_s3] ss:$0 sm:$0xff]  ;;  %vm1450_vm10 = vcmask 1047559  }
  0x1a   : > { %v1697_v3 = vld [vmem:[%s428_s18] sm:$0xff]  ;;  %s434_s28 = scalar_lea.vmem %s2299_s1, %s1589_s25  ;;  %s1506_s25 = sshll.u32 %s1503_s16, 4  ;;  %s1507_s25 = int_to_ptr.hbm [resolvable:$true] %s1506_s25 }
  0x1b   : > { %492 = vmatpush.bf16.msra.mxu0 %v1706_v2  ;;  %v2019_v4 = vld [vmem:[%s434_s28] sm:$0xff]  ;;  %v2024_v5 = vld [vmem:[%s434_s28 + $0x8] sm:$0xff]  ;;  %v2028_v6 = vld [vmem:[%s434_s28 + $0x10] sm:$0xff]  ;;  %s1492_s4 = scalar_lea.sflag [#allocation3], %s421_s26  ;;  %s1838_s19 = sshra.s32 %s1507_s25, 4  ;;  %s1839_s19 = int_to_ptr.hbm [resolvable:$true] %s1838_s19 }
  0x1c   : > { %1639 = vmatmul.msk.bf16.vlgmr.msra.gmra.mxu1 %vm551_vm1, %v2019_v4  ;;  %v2032_v7 = vld [vmem:[%s434_s28 + $0x18] sm:$0xff]  ;;  %v2036_v8 = vld [vmem:[%s434_s28 + $0x20] sm:$0xff]  ;;  %v2040_v9 = vld [vmem:[%s434_s28 + $0x28] sm:$0xff]  ;;  %805 = vmatpush.bf16.msra.mxu3 %v1710_v12  ;;  %s1840_s0 = scalar_lea.hbm %s1839_s19, 16  ;;  %s1844_s29 = scalar_lea.hbm %s2310_s12, 32 }
  0x1d   : > { %v2044_v10 = vld [vmem:[%s434_s28 + $0x30] sm:$0xff]  ;;  %v2054_v13 = vld [vmem:[%s434_s28 + $0x38] sm:$0xff]  ;;  %v2064_v19 = vld [vmem:[%s2303_s5] ss:$0 sm:$0xff]  ;;  %s1585_s28 = sshll.u32 %s421_s26, 4  ;;  %p1841_p12 = scmp.ne.s32.totalorder %s1839_s19, %s1840_s0 }
  0x1e   : > { %1602 = vmatmul.msk.bf16.vlgmr.msra.gmra.mxu0 %vm481_vm0, %v1697_v3  ;;  %s423_s17 = scalar_lea.vmem [#allocation2], %s1585_s28  ;;  %p1845_p1 = scmp.lt.s32.totalorder %s1839_s19, %s2310_s12 }
  0x1f   : > { %s1504_s18 = sshll.u32 %s423_s17, 4  ;;  %p1842_p13 = pnand %p1841_p12, %p1990_p5  ;;  %s1505_s18 = int_to_ptr.vmem [resolvable:$true] %s1504_s18 }
  0x20   : > { %p1846_p2 = scmp.lt.s32.totalorder %s1844_s29, %s1840_s0 }
  0x21   : > { %p1843_p0 = pneg %p1842_p13 }
  0x22   : > { %p1847_p3 = por %p1846_p2, %p1845_p1 }
  0x24   : > { %p1848_p4 = pnand %p1847_p3, %p1843_p0 }
  0x2c   : > { %1640 = vmatmul.msk.bf16.gmra.mxu1 %vm551_vm1, %v2024_v5 }
  0x3c   : > { %1641 = vmatmul.msk.bf16.gmra.mxu1 %vm551_vm1, %v2028_v6 }
  0x4c   : > { %1642 = vmatmul.msk.bf16.gmra.mxu1 %vm551_vm1, %v2032_v7 }
  0x5c   : > { %1643 = vmatmul.msk.bf16.gmra.mxu1 %vm551_vm1, %v2036_v8 }
  0x6c   : > { %1644 = vmatmul.msk.bf16.gmra.mxu1 %vm551_vm1, %v2040_v9 }
  0x7c   : > { %1645 = vmatmul.msk.bf16.gmra.mxu1 %vm551_vm1, %v2044_v10 }
  0x8c   : > { %1646 = vmatmul.msk.bf16.gmra.mxu1 %vm551_vm1, %v2054_v13 }
  0x99   : > { %v585_v16 = vpop.f32.mrf.mxu1 }
  0x9a   : > { %v586_v23 = vadd.f32 %v2064_v19, %v585_v16 }
  0x9b   : > { %v494_v15 = vpop.f32.mrf.mxu0 }
  0x9c   : > { %v495_v17 = vadd.f32 %v1756_v14, %v494_v15 }
  0x9e   : > { %v688_v18 = vrot.slane %v495_v17, 1  ;;  %v702_v20 = vperm.slane %v495_v17, 0  ;;  %v689_v29 = vrot.slane %v495_v17, 2  ;;  %v690_v30 = vrot.slane %v495_v17, 3 }
  0x9f   : > { %v691_v40 = vrot.slane %v495_v17, 4  ;;  %v692_v41 = vrot.slane %v495_v17, 5  ;;  %v693_v51 = vrot.slane %v495_v17, 6  ;;  %v694_v52 = vrot.slane %v495_v17, 7 }
  0xa0   : > { %v703_v21 = vperm.slane %v688_v18, 0  ;;  %v734_v25 = vmul.f32 %v702_v20, %v586_v23  ;;  %v704_v33 = vperm.slane %v689_v29, 0  ;;  %v705_v35 = vperm.slane %v690_v30, 0 }
  0xa1   : > { %v587_v22 = vpop.f32.mrf.mxu1  ;;  %v706_v44 = vperm.slane %v691_v40, 0  ;;  %v707_v46 = vperm.slane %v692_v41, 0  ;;  %v708_v55 = vperm.slane %v693_v51, 0  ;;  %v709_v57 = vperm.slane %v694_v52, 0 }
  0xa2   : > { %v588_v24 = vadd.f32 %v2064_v19, %v587_v22 }
  0xa3   : > { %v496_v61 = vpop.f32.mrf.mxu0 }
  0xa4   : > { %v735_v26 = vmul.f32 %v703_v21, %v588_v24  ;;  %v497_v63 = vadd.f32 %v1756_v14, %v496_v61 }
  0xa6   : > { %v750_v27 = vpack.c.bf16 %v735_v26, %v734_v25  ;;  %v695_v0 = vrot.slane %v497_v63, 1  ;;  %v710_v3 = vperm.slane %v497_v63, 0  ;;  %v696_v20 = vrot.slane %v497_v63, 2 }
  0xa7   : > { %v697_v21 = vrot.slane %v497_v63, 3  ;;  %v698_v30 = vrot.slane %v497_v63, 4  ;;  %v700_v41 = vrot.slane %v497_v63, 6 }
  0xa8   : > { %1667 = vmatmul.msk.bf16.vlgmr.msra.gmra.mxu3 %vm481_vm0, %v750_v27  ;;  %v711_v12 = vperm.slane %v695_v0, 0  ;;  %v712_v14 = vperm.slane %v696_v20, 0 }
  0xa9   : > { %v590_v28 = vpop.f32.mrf.mxu1  ;;  %v713_v25 = vperm.slane %v697_v21, 0 }
  0xaa   : > { %v591_v31 = vadd.f32 %v2064_v19, %v590_v28 }
  0xac   : > { %v736_v36 = vmul.f32 %v704_v33, %v591_v31  ;;  %v699_v31 = vrot.slane %v497_v63, 5 }
  0xb1   : > { %v592_v32 = vpop.f32.mrf.mxu1 }
  0xb2   : > { %v593_v34 = vadd.f32 %v2064_v19, %v592_v32 }
  0xb4   : > { %v737_v37 = vmul.f32 %v705_v35, %v593_v34  ;;  %v714_v34 = vperm.slane %v698_v30, 0 }
  0xb6   : > { %v751_v38 = vpack.c.bf16 %v737_v37, %v736_v36  ;;  %v715_v36 = vperm.slane %v699_v31, 0 }
  0xb8   : > { %1668 = vmatmul.msk.bf16.gmra.mxu3 %vm481_vm0, %v751_v38 }
  0xb9   : > { %v595_v39 = vpop.f32.mrf.mxu1 }
  0xba   : > { %v596_v42 = vadd.f32 %v2064_v19, %v595_v39 }
  0xbc   : > { %v738_v47 = vmul.f32 %v706_v44, %v596_v42  ;;  %v701_v42 = vrot.slane %v497_v63, 7 }
  0xc1   : > { %v597_v43 = vpop.f32.mrf.mxu1 }
  0xc2   : > { %v598_v45 = vadd.f32 %v2064_v19, %v597_v43 }
  0xc4   : > { %v739_v48 = vmul.f32 %v707_v46, %v598_v45  ;;  %v716_v45 = vperm.slane %v700_v41, 0 }
  0xc6   : > { %v752_v49 = vpack.c.bf16 %v739_v48, %v738_v47  ;;  %v717_v47 = vperm.slane %v701_v42, 0 }
  0xc8   : > { %1669 = vmatmul.msk.bf16.gmra.mxu3 %vm481_vm0, %v752_v49 }
  0xc9   : > { %v600_v50 = vpop.f32.mrf.mxu1 }
  0xca   : > { %v601_v53 = vadd.f32 %v2064_v19, %v600_v50 }
  0xcc   : > { %v740_v58 = vmul.f32 %v708_v55, %v601_v53 }
  0xd1   : > { %v602_v54 = vpop.f32.mrf.mxu1 }
  0xd2   : > { %v603_v56 = vadd.f32 %v2064_v19, %v602_v54 }
  0xd4   : > { %v741_v59 = vmul.f32 %v709_v57, %v603_v56  ;;  %v1709_v56 = vld [vmem:[%s2304_s6] sm:$0xff] }
  0xd5   : > { %644 = vmatpush.bf16.msra.mxu2 %v1709_v56 }
  0xd6   : > { %v753_v60 = vpack.c.bf16 %v741_v59, %v740_v58 }
  0xd8   : > { %1670 = vmatmul.msk.bf16.gmra.mxu3 %vm481_vm0, %v753_v60  ;;  %1651 = vmatmul.msk.bf16.vlgmr.msra.gmra.mxu2 %vm551_vm1, %v2019_v4 }
  0xd9   : > { %v605_v62 = vpop.f32.mrf.mxu1 }
  0xda   : > { %v606_v1 = vadd.f32 %v2064_v19, %v605_v62 }
  0xdc   : > { %v742_v15 = vmul.f32 %v710_v3, %v606_v1 }
  0xe1   : > { %v607_v2 = vpop.f32.mrf.mxu1 }
  0xe2   : > { %v608_v11 = vadd.f32 %v2064_v19, %v607_v2 }
  0xe4   : > { %v743_v16 = vmul.f32 %v711_v12, %v608_v11 }
  0xe6   : > { %v754_v17 = vpack.c.bf16 %v743_v16, %v742_v15 }
  0xe8   : > { %1671 = vmatmul.msk.bf16.gmra.mxu3 %vm481_vm0, %v754_v17  ;;  %1652 = vmatmul.msk.bf16.gmra.mxu2 %vm551_vm1, %v2024_v5 }
  0xe9   : > { %v610_v18 = vpop.f32.mrf.mxu1 }
  0xea   : > { %v611_v22 = vadd.f32 %v2064_v19, %v610_v18 }
  0xec   : > { %v744_v26 = vmul.f32 %v712_v14, %v611_v22  ;;  %v1176_v22 = vld [vmem:[%s2309_s11] sm:$0x3] }
  0xf1   : > { %v612_v23 = vpop.f32.mrf.mxu1 }
  0xf2   : > { %v613_v24 = vadd.f32 %v2064_v19, %v612_v23 }
  0xf4   : > { %v745_v27 = vmul.f32 %v713_v25, %v613_v24  ;;  %v1203_v24 = vsel %vm1201_vm3, %v1176_v22, 0 }
  0xf5   : > { %1212 = vmatpush.bf16.msrb.mxu0 %v1203_v24 }
  0xf6   : > { %v755_v28 = vpack.c.bf16 %v745_v27, %v744_v26 }
  0xf8   : > { %1672 = vmatmul.msk.bf16.gmra.mxu3 %vm481_vm0, %v755_v28  ;;  %1653 = vmatmul.msk.bf16.gmra.mxu2 %vm551_vm1, %v2028_v6 }
  0xf9   : > { %v615_v29 = vpop.f32.mrf.mxu1 }
  0xfa   : > { %v616_v32 = vadd.f32 %v2064_v19, %v615_v29 }
  0xfc   : > { %v746_v37 = vmul.f32 %v714_v34, %v616_v32 }
 0x101   : > { %v617_v33 = vpop.f32.mrf.mxu1 }
 0x102   : > { %v618_v35 = vadd.f32 %v2064_v19, %v617_v33 }
 0x104   : > { %v747_v38 = vmul.f32 %v715_v36, %v618_v35 }
 0x106   : > { %v756_v39 = vpack.c.bf16 %v747_v38, %v746_v37 }
 0x108   : > { %1673 = vmatmul.msk.bf16.gmra.mxu3 %vm481_vm0, %v756_v39  ;;  %1654 = vmatmul.msk.bf16.gmra.mxu2 %vm551_vm1, %v2032_v7 }
 0x109   : > { %v620_v40 = vpop.f32.mrf.mxu1 }
 0x10a   : > { %v621_v43 = vadd.f32 %v2064_v19, %v620_v40 }
 0x10c   : > { %v748_v48 = vmul.f32 %v716_v45, %v621_v43 }
 0x111   : > { %v622_v44 = vpop.f32.mrf.mxu1 }
 0x112   : > { %v623_v46 = vadd.f32 %v2064_v19, %v622_v44 }
 0x114   : > { %v749_v49 = vmul.f32 %v717_v47, %v623_v46 }
 0x116   : > { %v757_v50 = vpack.c.bf16 %v749_v49, %v748_v48 }
 0x118   : > { %1674 = vmatmul.msk.bf16.gmra.mxu3 %vm481_vm0, %v757_v50  ;;  %1655 = vmatmul.msk.bf16.gmra.mxu2 %vm551_vm1, %v2036_v8 }
 0x128   : > { %1656 = vmatmul.msk.bf16.gmra.mxu2 %vm551_vm1, %v2040_v9 }
 0x12b   : > { %v807_v51 = vpop.f32.mrf.mxu3 }
 0x12c   : > { %v847_v52 = vmul.f32 0.35355338, %v807_v51 }
 0x12e   : > { %v864_v53 = vsel %vm863_vm2, %v847_v52, -inf }
 0x12f   : > { %v865_v54 = vrot.slane %v864_v53, 4 }
 0x131   : > { %v866_v55 = vmax.f32 %v864_v53, %v865_v54 }
 0x133   : > { %v867_v57 = vrot.slane %v866_v55, 2  ;;  %v809_v58 = vpop.f32.mrf.mxu3 }
 0x134   : > { %v848_v19 = vmul.f32 0.35355338, %v809_v58 }
 0x135   : > { %v868_v59 = vmax.f32 %v866_v55, %v867_v57 }
 0x136   : > { %v871_v60 = vsel %vm863_vm2, %v848_v19, -inf }
 0x137   : > { %v869_v61 = vrot.slane %v868_v59, 1  ;;  %v872_v62 = vrot.slane %v871_v60, 4 }
 0x138   : > { %1657 = vmatmul.msk.bf16.gmra.mxu2 %vm551_vm1, %v2044_v10 }
 0x139   : > { %v870_v63 = vmax.f32 %v868_v59, %v869_v61  ;;  %v873_v0 = vmax.f32 %v871_v60, %v872_v62 }
 0x13b   : > { %v976_v1 = vsub.f32 %v847_v52, %v870_v63  ;;  %v874_v2 = vrot.slane %v873_v0, 2  ;;  %v812_v3 = vpop.f32.mrf.mxu3 }
 0x13c   : > { %v849_v11 = vmul.f32 0.35355338, %v812_v3 }
 0x13d   : > { %v992_v12 = vmul.f32 1.442695, %v976_v1  ;;  %v875_v15 = vmax.f32 %v873_v0, %v874_v2 }
 0x13e   : > { %v878_v16 = vsel %vm863_vm2, %v849_v11, -inf }
 0x13f   : > { %1760 = vpow2.f32 %v992_v12  ;;  %v876_v17 = vrot.slane %v875_v15, 1  ;;  %v879_v18 = vrot.slane %v878_v16, 4 }
 0x141   : > { %v877_v20 = vmax.f32 %v875_v15, %v876_v17  ;;  %v880_v21 = vmax.f32 %v878_v16, %v879_v18 }
 0x143   : > { %v977_v4 = vsub.f32 %v848_v19, %v877_v20  ;;  %v881_v23 = vrot.slane %v880_v21, 2  ;;  %v814_v14 = vpop.f32.mrf.mxu3 }
 0x144   : > { %v850_v25 = vmul.f32 0.35355338, %v814_v14 }
 0x145   : > { %v2101_v26 = vpop.eup %1760  ;;  %v994_v27 = vmul.f32 1.442695, %v977_v4  ;;  %v882_v28 = vmax.f32 %v880_v21, %v881_v23 }
 0x146   : > { %v1024_v29 = vsel %vm863_vm2, %v2101_v26, 0.0  ;;  %v885_v30 = vsel %vm863_vm2, %v850_v25, -inf }
 0x147   : > { %v1025_v31 = vrot.slane %v1024_v29, 4  ;;  %1762 = vpow2.f32 %v994_v27  ;;  %v883_v32 = vrot.slane %v882_v28, 1  ;;  %v886_v33 = vrot.slane %v885_v30, 4 }
 0x148   : > { %1658 = vmatmul.msk.bf16.gmra.mxu2 %vm551_vm1, %v2054_v13 }
 0x149   : > { %v1026_v34 = vadd.f32 %v1025_v31, %v1024_v29  ;;  %v884_v35 = vmax.f32 %v882_v28, %v883_v32  ;;  %v887_v36 = vmax.f32 %v885_v30, %v886_v33 }
 0x14b   : > { %v1027_v37 = vrot.slane %v1026_v34, 2  ;;  %v978_v38 = vsub.f32 %v849_v11, %v884_v35  ;;  %v888_v39 = vrot.slane %v887_v36, 2  ;;  %v817_v40 = vpop.f32.mrf.mxu3 }
 0x14c   : > { %v851_v41 = vmul.f32 0.35355338, %v817_v40 }
 0x14d   : > { %v1763_v42 = vpop.eup %1762  ;;  %v1028_v43 = vadd.f32 %v1027_v37, %v1026_v34  ;;  %v996_v44 = vmul.f32 1.442695, %v978_v38  ;;  %v889_v45 = vmax.f32 %v887_v36, %v888_v39 }
 0x14e   : > { %v1031_v46 = vsel %vm863_vm2, %v1763_v42, 0.0  ;;  %v892_v47 = vsel %vm863_vm2, %v851_v41, -inf }
 0x14f   : > { %v1032_v48 = vrot.slane %v1031_v46, 4  ;;  %1764 = vpow2.f32 %v996_v44  ;;  %v890_v49 = vrot.slane %v889_v45, 1  ;;  %v893_v5 = vrot.slane %v892_v47, 4 }
 0x150   : > { %v1029_v50 = vrot.slane %v1028_v43, 1 }
 0x151   : > { %v1033_v51 = vadd.f32 %v1032_v48, %v1031_v46  ;;  %v891_v52 = vmax.f32 %v889_v45, %v890_v49  ;;  %v894_v53 = vmax.f32 %v892_v47, %v893_v5 }
 0x152   : > { %v1030_v59 = vadd.f32 %v1029_v50, %v1028_v43 }
 0x153   : > { %v1034_v54 = vrot.slane %v1033_v51, 2  ;;  %v979_v55 = vsub.f32 %v850_v25, %v891_v52  ;;  %v819_v56 = vpop.f32.mrf.mxu3  ;;  %v895_v57 = vrot.slane %v894_v53, 2 }
 0x154   : > { %v852_v58 = vmul.f32 0.35355338, %v819_v56 }
 0x155   : > { %v2110_v19 = vpop.eup %1764  ;;  %v1035_v60 = vadd.f32 %v1034_v54, %v1033_v51  ;;  %v998_v61 = vmul.f32 1.442695, %v979_v55  ;;  %v896_v63 = vmax.f32 %v894_v53, %v895_v57 }
 0x156   : > { %v1038_v62 = vsel %vm863_vm2, %v2110_v19, 0.0  ;;  %v899_v0 = vsel %vm863_vm2, %v852_v58, -inf }
 0x157   : > { %v1036_v1 = vrot.slane %v1035_v60, 1  ;;  %v1039_v2 = vrot.slane %v1038_v62, 4  ;;  %1766 = vpow2.f32 %v998_v61  ;;  %v900_v3 = vrot.slane %v899_v0, 4 }
 0x158   : > { %v897_v11 = vrot.slane %v896_v63, 1  ;;  %1768 = vrcp.f32 %v1030_v59 }
 0x159   : > { %v1037_v12 = vadd.f32 %v1036_v1, %v1035_v60  ;;  %v1040_v15 = vadd.f32 %v1039_v2, %v1038_v62  ;;  %v901_v16 = vmax.f32 %v899_v0, %v900_v3 }
 0x15a   : > { %v898_v17 = vmax.f32 %v896_v63, %v897_v11 }
 0x15b   : > { %1770 = vrcp.f32 %v1037_v12  ;;  %v1041_v18 = vrot.slane %v1040_v15, 2  ;;  %v902_v20 = vrot.slane %v901_v16, 2  ;;  %v822_v21 = vpop.f32.mrf.mxu3 }
 0x15c   : > { %v980_v22 = vsub.f32 %v851_v41, %v898_v17  ;;  %v853_v4 = vmul.f32 0.35355338, %v822_v21 }
 0x15d   : > { %v2117_v23 = vpop.eup %1766  ;;  %v1042_v14 = vadd.f32 %v1041_v18, %v1040_v15  ;;  %v903_v24 = vmax.f32 %v901_v16, %v902_v20 }
 0x15e   : > { %v1045_v25 = vsel %vm863_vm2, %v2117_v23, 0.0  ;;  %v1000_v6 = vmul.f32 1.442695, %v980_v22  ;;  %v906_v27 = vsel %vm863_vm2, %v853_v4, -inf  ;;  %v1769_v28 = vpop.eup %1768 }
 0x15f   : > { %v1046_v29 = vrot.slane %v1045_v25, 4  ;;  %v904_v30 = vrot.slane %v903_v24, 1  ;;  %v907_v31 = vrot.slane %v906_v27, 4  ;;  %v1043_v36 = vrot.slane %v1042_v14, 1 }
 0x160   : > { %1772 = vpow2.f32 %v1000_v6  ;;  %v1152_v37 = vmul.f32 %v1769_v28, %v2101_v26 }
 0x161   : > { %v1771_v32 = vpop.eup %1770  ;;  %v1047_v33 = vadd.f32 %v1046_v29, %v1045_v25  ;;  %v905_v34 = vmax.f32 %v903_v24, %v904_v30  ;;  %v908_v35 = vmax.f32 %v906_v27, %v907_v31  ;;  %v1044_v49 = vadd.f32 %v1043_v36, %v1042_v14 }
 0x162   : > { %v1153_v38 = vmul.f32 %v1771_v32, %v1763_v42 }
 0x163   : > { %v1048_v39 = vrot.slane %v1047_v33, 2  ;;  %v981_v40 = vsub.f32 %v852_v58, %v905_v34  ;;  %v909_v41 = vrot.slane %v908_v35, 2  ;;  %v824_v43 = vpop.f32.mrf.mxu3 }
 0x164   : > { %v854_v44 = vmul.f32 0.35355338, %v824_v43  ;;  %v1168_v45 = vpack.c.bf16 %v1153_v38, %v1152_v37 }
 0x165   : > { %v1049_v46 = vadd.f32 %v1048_v39, %v1047_v33  ;;  %v1002_v47 = vmul.f32 1.442695, %v981_v40  ;;  %v910_v48 = vmax.f32 %v908_v35, %v909_v41 }
 0x166   : > { %v2123_v5 = vpop.eup %1772  ;;  %v913_v50 = vsel %vm863_vm2, %v854_v44, -inf  ;;  %1675 = vmatmul.msk.bf16.vlgmr.msrb.gmra.mxu0 %vm863_vm2, %v1168_v45 }
 0x167   : > { %v1052_v26 = vsel %vm863_vm2, %v2123_v5, 0.0  ;;  %1774 = vpow2.f32 %v1002_v47  ;;  %v911_v42 = vrot.slane %v910_v48, 1  ;;  %v914_v51 = vrot.slane %v913_v50, 4 }
 0x168   : > { %v1053_v52 = vrot.slane %v1052_v26, 4  ;;  %v1050_v53 = vrot.slane %v1049_v46, 1  ;;  %1776 = vrcp.f32 %v1044_v49 }
 0x169   : > { %v912_v54 = vmax.f32 %v910_v48, %v911_v42  ;;  %v915_v55 = vmax.f32 %v913_v50, %v914_v51 }
 0x16a   : > { %v1054_v56 = vadd.f32 %v1053_v52, %v1052_v26  ;;  %v1051_v57 = vadd.f32 %v1050_v53, %v1049_v46 }
 0x16b   : > { %v982_v58 = vsub.f32 %v853_v4, %v912_v54  ;;  %v916_v59 = vrot.slane %v915_v55, 2  ;;  %v827_v60 = vpop.f32.mrf.mxu3 }
 0x16c   : > { %v1055_v61 = vrot.slane %v1054_v56, 2  ;;  %v855_v62 = vmul.f32 0.35355338, %v827_v60  ;;  %1778 = vrcp.f32 %v1051_v57 }
 0x16d   : > { %v2131_v63 = vpop.eup %1774  ;;  %v1004_v0 = vmul.f32 1.442695, %v982_v58  ;;  %v917_v1 = vmax.f32 %v915_v55, %v916_v59 }
 0x16e   : > { %v1056_v2 = vadd.f32 %v1055_v61, %v1054_v56  ;;  %v1059_v7 = vsel %vm863_vm2, %v2131_v63, 0.0  ;;  %v920_v3 = vsel %vm863_vm2, %v855_v62, -inf  ;;  %v1777_v11 = vpop.eup %1776 }
 0x16f   : > { %v1060_v12 = vrot.slane %v1059_v7, 4  ;;  %1780 = vpow2.f32 %v1004_v0  ;;  %v918_v15 = vrot.slane %v917_v1, 1  ;;  %v921_v16 = vrot.slane %v920_v3, 4 }
 0x170   : > { %v1057_v17 = vrot.slane %v1056_v2, 1  ;;  %v1154_v4 = vmul.f32 %v1777_v11, %v2110_v19 }
 0x171   : > { %v1061_v18 = vadd.f32 %v1060_v12, %v1059_v7  ;;  %v919_v20 = vmax.f32 %v917_v1, %v918_v15  ;;  %v922_v21 = vmax.f32 %v920_v3, %v921_v16 }
 0x172   : > { %v1779_v22 = vpop.eup %1778  ;;  %v1058_v29 = vadd.f32 %v1057_v17, %v1056_v2 }
 0x173   : > { %v1062_v14 = vrot.slane %v1061_v18, 2  ;;  %v983_v24 = vsub.f32 %v854_v44, %v919_v20  ;;  %v923_v25 = vrot.slane %v922_v21, 2  ;;  %v829_v6 = vpop.f32.mrf.mxu3  ;;  %v1155_v27 = vmul.f32 %v1779_v22, %v2117_v23 }
 0x174   : > { %v856_v28 = vmul.f32 0.35355338, %v829_v6 }
 0x175   : > { %v2138_v30 = vpop.eup %1780  ;;  %v1063_v31 = vadd.f32 %v1062_v14, %v1061_v18  ;;  %v1006_v32 = vmul.f32 1.442695, %v983_v24  ;;  %v924_v33 = vmax.f32 %v922_v21, %v923_v25  ;;  %v1169_v34 = vpack.c.bf16 %v1155_v27, %v1154_v4 }
 0x176   : > { %v1066_v35 = vsel %vm863_vm2, %v2138_v30, 0.0  ;;  %v927_v36 = vsel %vm863_vm2, %v856_v28, -inf }
 0x177   : > { %v1067_v19 = vrot.slane %v1066_v35, 4  ;;  %1782 = vpow2.f32 %v1006_v32  ;;  %v925_v37 = vrot.slane %v924_v33, 1  ;;  %v928_v38 = vrot.slane %v927_v36, 4  ;;  %1676 = vmatmul.msk.bf16.gmra.mxu0 %vm863_vm2, %v1169_v34 }
 0x178   : > { %v1064_v23 = vrot.slane %v1063_v31, 1  ;;  %1784 = vrcp.f32 %v1058_v29 }
 0x179   : > { %v1068_v39 = vadd.f32 %v1067_v19, %v1066_v35  ;;  %v926_v40 = vmax.f32 %v924_v33, %v925_v37  ;;  %v929_v41 = vmax.f32 %v927_v36, %v928_v38 }
 0x17a   : > { %v1065_v43 = vadd.f32 %v1064_v23, %v1063_v31 }
 0x17b   : > { %v1069_v44 = vrot.slane %v1068_v39, 2  ;;  %v984_v45 = vsub.f32 %v855_v62, %v926_v40  ;;  %v930_v46 = vrot.slane %v929_v41, 2  ;;  %v832_v47 = vpop.f32.mrf.mxu3 }
 0x17c   : > { %v857_v48 = vmul.f32 0.35355338, %v832_v47  ;;  %1786 = vrcp.f32 %v1065_v43 }
 0x17d   : > { %v2146_v49 = vpop.eup %1782  ;;  %v1070_v50 = vadd.f32 %v1069_v44, %v1068_v39  ;;  %v1008_v26 = vmul.f32 1.442695, %v984_v45  ;;  %v931_v42 = vmax.f32 %v929_v41, %v930_v46 }
 0x17e   : > { %v1073_v8 = vsel %vm863_vm2, %v2146_v49, 0.0  ;;  %v934_v51 = vsel %vm863_vm2, %v857_v48, -inf  ;;  %v1785_v52 = vpop.eup %1784 }
 0x17f   : > { %v1074_v53 = vrot.slane %v1073_v8, 4  ;;  %1788 = vpow2.f32 %v1008_v26  ;;  %v932_v54 = vrot.slane %v931_v42, 1  ;;  %v935_v55 = vrot.slane %v934_v51, 4 }
 0x180   : > { %v1071_v56 = vrot.slane %v1070_v50, 1  ;;  %v1156_v61 = vmul.f32 %v1785_v52, %v2123_v5 }
 0x181   : > { %v1075_v57 = vadd.f32 %v1074_v53, %v1073_v8  ;;  %v933_v58 = vmax.f32 %v931_v42, %v932_v54  ;;  %v936_v59 = vmax.f32 %v934_v51, %v935_v55 }
 0x182   : > { %v1787_v60 = vpop.eup %1786  ;;  %v1072_v11 = vadd.f32 %v1071_v56, %v1070_v50 }
 0x183   : > { %v1076_v62 = vrot.slane %v1075_v57, 2  ;;  %v985_v0 = vsub.f32 %v856_v28, %v933_v58  ;;  %v937_v1 = vrot.slane %v936_v59, 2  ;;  %v834_v2 = vpop.f32.mrf.mxu3  ;;  %v1157_v7 = vmul.f32 %v1787_v60, %v2131_v63 }
 0x184   : > { %v858_v3 = vmul.f32 0.35355338, %v834_v2 }
 0x185   : > { %v2153_v12 = vpop.eup %1788  ;;  %v1077_v15 = vadd.f32 %v1076_v62, %v1075_v57  ;;  %v1010_v16 = vmul.f32 1.442695, %v985_v0  ;;  %v938_v17 = vmax.f32 %v936_v59, %v937_v1  ;;  %v1170_v18 = vpack.c.bf16 %v1157_v7, %v1156_v61 }
 0x186   : > { %v1080_v20 = vsel %vm863_vm2, %v2153_v12, 0.0  ;;  %v941_v21 = vsel %vm863_vm2, %v858_v3, -inf }
 0x187   : > { %v1081_v5 = vrot.slane %v1080_v20, 4  ;;  %1790 = vpow2.f32 %v1010_v16  ;;  %v939_v22 = vrot.slane %v938_v17, 1  ;;  %v942_v4 = vrot.slane %v941_v21, 4  ;;  %1677 = vmatmul.msk.bf16.gmra.mxu0 %vm863_vm2, %v1170_v18 }
 0x188   : > { %v1078_v63 = vrot.slane %v1077_v15, 1  ;;  %1792 = vrcp.f32 %v1072_v11 }
 0x189   : > { %v1082_v14 = vadd.f32 %v1081_v5, %v1080_v20  ;;  %v940_v24 = vmax.f32 %v938_v17, %v939_v22  ;;  %v943_v25 = vmax.f32 %v941_v21, %v942_v4 }
 0x18a   : > { %v1079_v6 = vadd.f32 %v1078_v63, %v1077_v15 }
 0x18b   : > { %v1083_v27 = vrot.slane %v1082_v14, 2  ;;  %v986_v28 = vsub.f32 %v857_v48, %v940_v24  ;;  %v944_v29 = vrot.slane %v943_v25, 2  ;;  %v837_v31 = vpop.f32.mrf.mxu3 }
 0x18c   : > { %v859_v32 = vmul.f32 0.35355338, %v837_v31  ;;  %1794 = vrcp.f32 %v1079_v6 }
 0x18d   : > { %v2161_v33 = vpop.eup %1790  ;;  %v1084_v34 = vadd.f32 %v1083_v27, %v1082_v14  ;;  %v1012_v35 = vmul.f32 1.442695, %v986_v28  ;;  %v945_v36 = vmax.f32 %v943_v25, %v944_v29 }
 0x18e   : > { %v1087_v9 = vsel %vm863_vm2, %v2161_v33, 0.0  ;;  %v948_v19 = vsel %vm863_vm2, %v859_v32, -inf  ;;  %v1793_v37 = vpop.eup %1792 }
 0x18f   : > { %v1088_v38 = vrot.slane %v1087_v9, 4  ;;  %1796 = vpow2.f32 %v1012_v35  ;;  %v946_v23 = vrot.slane %v945_v36, 1  ;;  %v949_v39 = vrot.slane %v948_v19, 4 }
 0x190   : > { %v1085_v40 = vrot.slane %v1084_v34, 1  ;;  %v1158_v46 = vmul.f32 %v1793_v37, %v2138_v30 }
 0x191   : > { %v1089_v41 = vadd.f32 %v1088_v38, %v1087_v9  ;;  %v947_v43 = vmax.f32 %v945_v36, %v946_v23  ;;  %v950_v44 = vmax.f32 %v948_v19, %v949_v39 }
 0x192   : > { %v1795_v45 = vpop.eup %1794  ;;  %v1086_v51 = vadd.f32 %v1085_v40, %v1084_v34 }
 0x193   : > { %v1090_v47 = vrot.slane %v1089_v41, 2  ;;  %v987_v48 = vsub.f32 %v858_v3, %v947_v43  ;;  %v951_v50 = vrot.slane %v950_v44, 2  ;;  %v839_v26 = vpop.f32.mrf.mxu3  ;;  %v1159_v42 = vmul.f32 %v1795_v45, %v2146_v49 }
 0x194   : > { %v860_v8 = vmul.f32 0.35355338, %v839_v26 }
 0x195   : > { %v2168_v52 = vpop.eup %1796  ;;  %v1091_v53 = vadd.f32 %v1090_v47, %v1089_v41  ;;  %v1014_v54 = vmul.f32 1.442695, %v987_v48  ;;  %v952_v55 = vmax.f32 %v950_v44, %v951_v50  ;;  %v1171_v56 = vpack.c.bf16 %v1159_v42, %v1158_v46 }
 0x196   : > { %v1094_v57 = vsel %vm863_vm2, %v2168_v52, 0.0  ;;  %v955_v58 = vsel %vm863_vm2, %v860_v8, -inf }
 0x197   : > { %v1095_v30 = vrot.slane %v1094_v57, 4  ;;  %1798 = vpow2.f32 %v1014_v54  ;;  %v953_v59 = vrot.slane %v952_v55, 1  ;;  %v956_v60 = vrot.slane %v955_v58, 4  ;;  %1678 = vmatmul.msk.bf16.gmra.mxu0 %vm863_vm2, %v1171_v56 }
 0x198   : > { %v1092_v49 = vrot.slane %v1091_v53, 1  ;;  %1800 = vrcp.f32 %v1086_v51 }
 0x199   : > { %v1096_v61 = vadd.f32 %v1095_v30, %v1094_v57  ;;  %v954_v62 = vmax.f32 %v952_v55, %v953_v59  ;;  %v957_v0 = vmax.f32 %v955_v58, %v956_v60 }
 0x19a   : > { %v1093_v1 = vadd.f32 %v1092_v49, %v1091_v53 }
 0x19b   : > { %v1097_v2 = vrot.slane %v1096_v61, 2  ;;  %v988_v7 = vsub.f32 %v859_v32, %v954_v62  ;;  %v958_v3 = vrot.slane %v957_v0, 2  ;;  %v842_v11 = vpop.f32.mrf.mxu3 }
 0x19c   : > { %v861_v15 = vmul.f32 0.35355338, %v842_v11  ;;  %1802 = vrcp.f32 %v1093_v1 }
 0x19d   : > { %v2176_v16 = vpop.eup %1798  ;;  %v1016_v17 = vmul.f32 1.442695, %v988_v7  ;;  %v959_v18 = vmax.f32 %v957_v0, %v958_v3  ;;  %v1098_v20 = vadd.f32 %v1097_v2, %v1096_v61 }
 0x19e   : > { %v1101_v10 = vsel %vm863_vm2, %v2176_v16, 0.0  ;;  %v962_v21 = vsel %vm863_vm2, %v861_v15, -inf  ;;  %v1801_v5 = vpop.eup %1800 }
 0x19f   : > { %v1102_v22 = vrot.slane %v1101_v10, 4  ;;  %1804 = vpow2.f32 %v1016_v17  ;;  %v960_v4 = vrot.slane %v959_v18, 1  ;;  %v963_v63 = vrot.slane %v962_v21, 4 }
 0x1a0   : > { %v1160_v27 = vmul.f32 %v1801_v5, %v2153_v12  ;;  %v1099_v28 = vrot.slane %v1098_v20, 1 }
 0x1a1   : > { %v1103_v14 = vadd.f32 %v1102_v22, %v1101_v10  ;;  %v961_v24 = vmax.f32 %v959_v18, %v960_v4  ;;  %v964_v25 = vmax.f32 %v962_v21, %v963_v63 }
 0x1a2   : > { %v1803_v6 = vpop.eup %1802  ;;  %v1100_v12 = vadd.f32 %v1099_v28, %v1098_v20 }
 0x1a3   : > { %v1104_v29 = vrot.slane %v1103_v14, 2  ;;  %v989_v31 = vsub.f32 %v860_v8, %v961_v24  ;;  %v965_v32 = vrot.slane %v964_v25, 2  ;;  %v844_v34 = vpop.f32.mrf.mxu3  ;;  %v1161_v35 = vmul.f32 %v1803_v6, %v2161_v33 }
 0x1a4   : > { %v862_v36 = vmul.f32 0.35355338, %v844_v34 }
 0x1a5   : > { %v2183_v9 = vpop.eup %1804  ;;  %v1105_v19 = vadd.f32 %v1104_v29, %v1103_v14  ;;  %v1018_v37 = vmul.f32 1.442695, %v989_v31  ;;  %v966_v38 = vmax.f32 %v964_v25, %v965_v32  ;;  %v1172_v23 = vpack.c.bf16 %v1161_v35, %v1160_v27  ;;  %v646_v27 = vpop.f32.mrf.mxu2 }
 0x1a6   : > { %v1108_v39 = vsel %vm863_vm2, %v2183_v9, 0.0  ;;  %v969_v40 = vsel %vm863_vm2, %v862_v36, -inf }
 0x1a7   : > { %v1109_v41 = vrot.slane %v1108_v39, 4  ;;  %1806 = vpow2.f32 %v1018_v37  ;;  %v967_v43 = vrot.slane %v966_v38, 1  ;;  %v970_v44 = vrot.slane %v969_v40, 4  ;;  %1679 = vmatmul.msk.bf16.gmra.mxu0 %vm863_vm2, %v1172_v23 }
 0x1a8   : > { %v1106_v33 = vrot.slane %v1105_v19, 1  ;;  %1808 = vrcp.f32 %v1100_v12  ;;  %v1713_v12 = vld [vmem:[%s2306_s8 + $0x8] sm:$0xff] }
 0x1a9   : > { %v1110_v45 = vadd.f32 %v1109_v41, %v1108_v39  ;;  %v968_v46 = vmax.f32 %v966_v38, %v967_v43  ;;  %v971_v47 = vmax.f32 %v969_v40, %v970_v44  ;;  %1481 = vmatpush.bf16.msrb.mxu1 %v1713_v12 }
 0x1aa   : > { %v1107_v48 = vadd.f32 %v1106_v33, %v1105_v19 }
 0x1ab   : > { %v1111_v50 = vrot.slane %v1110_v45, 2  ;;  %v990_v26 = vsub.f32 %v861_v15, %v968_v46  ;;  %v972_v42 = vrot.slane %v971_v47, 2 }
 0x1ac   : > { %1810 = vrcp.f32 %v1107_v48 }
 0x1ad   : > { %v1807_v8 = vpop.eup %1806  ;;  %v1112_v51 = vadd.f32 %v1111_v50, %v1110_v45  ;;  %v1020_v53 = vmul.f32 1.442695, %v990_v26  ;;  %v973_v54 = vmax.f32 %v971_v47, %v972_v42 }
 0x1ae   : > { %v1115_v55 = vsel %vm863_vm2, %v1807_v8, 0.0  ;;  %v1809_v13 = vpop.eup %1808 }
 0x1af   : > { %v1116_v56 = vrot.slane %v1115_v55, 4  ;;  %1812 = vpow2.f32 %v1020_v53  ;;  %v974_v57 = vrot.slane %v973_v54, 1  ;;  %v1113_v59 = vrot.slane %v1112_v51, 1 }
 0x1b0   : > { %v1162_v62 = vmul.f32 %v1809_v13, %v2168_v52 }
 0x1b1   : > { %v1117_v58 = vadd.f32 %v1116_v56, %v1115_v55  ;;  %v975_v30 = vmax.f32 %v973_v54, %v974_v57  ;;  %v1114_v11 = vadd.f32 %v1113_v59, %v1112_v51 }
 0x1b2   : > { %v1811_v60 = vpop.eup %1810 }
 0x1b3   : > { %v1118_v49 = vrot.slane %v1117_v58, 2  ;;  %v991_v61 = vsub.f32 %v862_v36, %v975_v30  ;;  %v1163_v0 = vmul.f32 %v1811_v60, %v2176_v16  ;;  %v648_v36 = vpop.f32.mrf.mxu2 }
 0x1b5   : > { %v1813_v1 = vpop.eup %1812  ;;  %v1119_v2 = vadd.f32 %v1118_v49, %v1117_v58  ;;  %v1022_v7 = vmul.f32 1.442695, %v991_v61  ;;  %v1173_v3 = vpack.c.bf16 %v1163_v0, %v1162_v62 }
 0x1b6   : > { %v1122_v15 = vsel %vm863_vm2, %v1813_v1, 0.0 }
 0x1b7   : > { %v1123_v17 = vrot.slane %v1122_v15, 4  ;;  %1814 = vpow2.f32 %v1022_v7  ;;  %1680 = vmatmul.msk.bf16.gmra.mxu0 %vm863_vm2, %v1173_v3  ;;  %v1120_v18 = vrot.slane %v1119_v2, 1 }
 0x1b8   : > { %1816 = vrcp.f32 %v1114_v11 }
 0x1b9   : > { %v1124_v20 = vadd.f32 %v1123_v17, %v1122_v15  ;;  %v1121_v10 = vadd.f32 %v1120_v18, %v1119_v2 }
 0x1bb   : > { %v1125_v21 = vrot.slane %v1124_v20, 2  ;;  %1818 = vrcp.f32 %v1121_v10  ;;  %v651_v40 = vpop.f32.mrf.mxu2 }
 0x1bd   : > { %v1815_v52 = vpop.eup %1814  ;;  %v1126_v5 = vadd.f32 %v1125_v21, %v1124_v20 }
 0x1be   : > { %v1129_v16 = vsel %vm863_vm2, %v1815_v52, 0.0  ;;  %v1817_v22 = vpop.eup %1816 }
 0x1bf   : > { %v1130_v4 = vrot.slane %v1129_v16, 4  ;;  %v1127_v24 = vrot.slane %v1126_v5, 1  ;;  %v1164_v25 = vmul.f32 %v1817_v22, %v2183_v9  ;;  %v2203_v9 = vld [vmem:[%s2305_s7] ss:$0 sm:$0xff] }
 0x1c0   : > { %v647_v41 = vadd.f32 %v2203_v9, %v646_v27  ;;  %v649_v48 = vadd.f32 %v2203_v9, %v648_v36  ;;  %v652_v56 = vadd.f32 %v2203_v9, %v651_v40 }
 0x1c1   : > { %v1819_v63 = vpop.eup %1818  ;;  %v1131_v14 = vadd.f32 %v1130_v4, %v1129_v16  ;;  %v1128_v32 = vadd.f32 %v1127_v24, %v1126_v5 }
 0x1c2   : > { %v1165_v6 = vmul.f32 %v1819_v63, %v1807_v8 }
 0x1c3   : > { %v1132_v28 = vrot.slane %v1131_v14, 2  ;;  %1820 = vrcp.f32 %v1128_v32  ;;  %v653_v43 = vpop.f32.mrf.mxu2 }
 0x1c4   : > { %v1174_v29 = vpack.c.bf16 %v1165_v6, %v1164_v25  ;;  %v654_v11 = vadd.f32 %v2203_v9, %v653_v43 }
 0x1c5   : > { %v1133_v31 = vadd.f32 %v1132_v28, %v1131_v14 }
 0x1c7   : > { %v1134_v34 = vrot.slane %v1133_v31, 1  ;;  %1681 = vmatmul.msk.bf16.gmra.mxu0 %vm863_vm2, %v1174_v29 }
 0x1c9   : > { %v1135_v35 = vadd.f32 %v1134_v34, %v1133_v31  ;;  %v1821_v19 = vpop.eup %1820 }
 0x1ca   : > { %v1166_v38 = vmul.f32 %v1821_v19, %v1813_v1 }
 0x1cb   : > { %1822 = vrcp.f32 %v1135_v35  ;;  %v656_v50 = vpop.f32.mrf.mxu2 }
 0x1cc   : > { %v657_v63 = vadd.f32 %v2203_v9, %v656_v50 }
 0x1d1   : > { %v1823_v37 = vpop.eup %1822 }
 0x1d2   : > { %v1167_v23 = vmul.f32 %v1823_v37, %v1815_v52 }
 0x1d3   : > { %v658_v30 = vpop.f32.mrf.mxu2 }
 0x1d4   : > { %v1175_v39 = vpack.c.bf16 %v1167_v23, %v1166_v38  ;;  %v659_v23 = vadd.f32 %v2203_v9, %v658_v30 }
 0x1d7   : > { %1682 = vmatmul.msk.bf16.gmra.mxu0 %vm863_vm2, %v1175_v39 }
 0x1db   : > { %v661_v52 = vpop.f32.mrf.mxu2 }
 0x1e3   : > { %v1214_v44 = vpop.f32.mrf.mxu0  ;;  %v663_v19 = vpop.f32.mrf.mxu2 }
 0x1e4   : > { %v1254_v33 = vmul.f32 %v1214_v44, %v647_v41 }
 0x1e6   : > { %v1270_v45 = vsel %vm481_vm0, %v1254_v33, 0.0 }
 0x1e7   : > { %v1271_v46 = vrot.slane %v1270_v45, 4 }
 0x1e9   : > { %v1272_v47 = vadd.f32 %v1271_v46, %v1270_v45 }
 0x1eb   : > { %v1273_v26 = vrot.slane %v1272_v47, 2  ;;  %v1216_v42 = vpop.f32.mrf.mxu0 }
 0x1ec   : > { %v1255_v8 = vmul.f32 %v1216_v42, %v649_v48  ;;  %v662_v48 = vadd.f32 %v2203_v9, %v661_v52  ;;  %v666_v42 = vpop.f32.mrf.mxu2 }
 0x1ed   : > { %v1274_v51 = vadd.f32 %v1273_v26, %v1272_v47 }
 0x1ee   : > { %v1277_v53 = vsel %vm481_vm0, %v1255_v8, 0.0 }
 0x1ef   : > { %v1278_v54 = vrot.slane %v1277_v53, 4  ;;  %v1275_v55 = vrot.slane %v1274_v51, 1 }
 0x1f1   : > { %v1279_v57 = vadd.f32 %v1278_v54, %v1277_v53  ;;  %v1276_v59 = vadd.f32 %v1275_v55, %v1274_v51 }
 0x1f3   : > { %v1280_v13 = vrot.slane %v1279_v57, 2  ;;  %v1382_v1 = vpack.c.bf16 %v1276_v59, %v1276_v59 }
 0x1f4   : > { %v1219_v58 = vpop.f32.mrf.mxu0 }
 0x1f5   : > { %v1281_v60 = vadd.f32 %v1280_v13, %v1279_v57  ;;  %v1256_v49 = vmul.f32 %v1219_v58, %v652_v56  ;;  %v1422_v18 = vunpack.c.l.b16 %v1382_v1  ;;  %v668_v1 = vpop.f32.mrf.mxu2 }
 0x1f7   : > { %v1282_v61 = vrot.slane %v1281_v60, 1  ;;  %v1284_v62 = vsel %vm481_vm0, %v1256_v49, 0.0  ;;  %v664_v49 = vadd.f32 %v2203_v9, %v663_v19  ;;  %v667_v19 = vadd.f32 %v2203_v9, %v666_v42 }
 0x1f8   : > { %v1285_v0 = vrot.slane %v1284_v62, 4 }
 0x1f9   : > { %v1283_v2 = vadd.f32 %v1282_v61, %v1281_v60 }
 0x1fa   : > { %v1286_v7 = vadd.f32 %v1285_v0, %v1284_v62 }
 0x1fb   : > { %v1383_v3 = vpack.c.bf16 %v1283_v2, %v1283_v2 }
 0x1fc   : > { %v1287_v15 = vrot.slane %v1286_v7, 2  ;;  %v1221_v17 = vpop.f32.mrf.mxu0 }
 0x1fd   : > { %v1423_v20 = vunpack.c.l.b16 %v1383_v3  ;;  %v1257_v10 = vmul.f32 %v1221_v17, %v654_v11 }
 0x1fe   : > { %v1288_v21 = vadd.f32 %v1287_v15, %v1286_v7 }
 0x1ff   : > { %v1439_v5 = vsel %vm1438_vm4, %v1423_v20, %v1422_v18  ;;  %v1291_v16 = vsel %vm481_vm0, %v1257_v10, 0.0  ;;  %v1712_v18 = vld [vmem:[%s2306_s8] sm:$0xff] }
 0x200   : > { %v1289_v22 = vrot.slane %v1288_v21, 1  ;;  %v1292_v4 = vrot.slane %v1291_v16, 4  ;;  %1482 = vmatpush.bf16.msrb.mxu1 %v1712_v18 }
 0x202   : > { %v1290_v14 = vadd.f32 %v1289_v22, %v1288_v21  ;;  %v1293_v24 = vadd.f32 %v1292_v4, %v1291_v16 }
 0x204   : > { %v1384_v25 = vpack.c.bf16 %v1290_v14, %v1290_v14  ;;  %v1294_v6 = vrot.slane %v1293_v24, 2  ;;  %v1224_v27 = vpop.f32.mrf.mxu0 }
 0x205   : > { %v1258_v28 = vmul.f32 %v1224_v27, %v657_v63  ;;  %v671_v63 = vpop.f32.mrf.mxu2 }
 0x206   : > { %v1424_v29 = vunpack.c.l.b16 %v1384_v25  ;;  %v1295_v31 = vadd.f32 %v1294_v6, %v1293_v24 }
 0x207   : > { %v1298_v32 = vsel %vm481_vm0, %v1258_v28, 0.0 }
 0x208   : > { %v1441_v34 = vsel %vm1440_vm5, %v1424_v29, %v1439_v5  ;;  %v1296_v35 = vrot.slane %v1295_v31, 1  ;;  %v1299_v36 = vrot.slane %v1298_v32, 4 }
 0x20a   : > { %v1297_v37 = vadd.f32 %v1296_v35, %v1295_v31  ;;  %v1300_v38 = vadd.f32 %v1299_v36, %v1298_v32  ;;  %v672_v36 = vadd.f32 %v2203_v9, %v671_v63 }
 0x20c   : > { %v1385_v39 = vpack.c.bf16 %v1297_v37, %v1297_v37  ;;  %v1301_v40 = vrot.slane %v1300_v38, 2  ;;  %v1226_v12 = vpop.f32.mrf.mxu0  ;;  %v669_v37 = vadd.f32 %v2203_v9, %v668_v1 }
 0x20d   : > { %v1259_v41 = vmul.f32 %v1226_v12, %v659_v23  ;;  %v673_v29 = vpop.f32.mrf.mxu2 }
 0x20e   : > { %v1425_v43 = vunpack.c.l.b16 %v1385_v39  ;;  %v1302_v44 = vadd.f32 %v1301_v40, %v1300_v38  ;;  %v674_v39 = vadd.f32 %v2203_v9, %v673_v29 }
 0x20f   : > { %v1305_v33 = vsel %vm481_vm0, %v1259_v41, 0.0 }
 0x210   : > { %v1443_v45 = vsel %vm1442_vm6, %v1425_v43, %v1441_v34  ;;  %v1303_v46 = vrot.slane %v1302_v44, 1  ;;  %v1306_v47 = vrot.slane %v1305_v33, 4 }
 0x212   : > { %v1304_v50 = vadd.f32 %v1303_v46, %v1302_v44  ;;  %v1307_v26 = vadd.f32 %v1306_v47, %v1305_v33 }
 0x214   : > { %v1386_v8 = vpack.c.bf16 %v1304_v50, %v1304_v50  ;;  %v1308_v51 = vrot.slane %v1307_v26, 2  ;;  %v1229_v53 = vpop.f32.mrf.mxu0 }
 0x215   : > { %v1260_v54 = vmul.f32 %v1229_v53, %v662_v48  ;;  %v676_v34 = vpop.f32.mrf.mxu2 }
 0x216   : > { %v1426_v55 = vunpack.c.l.b16 %v1386_v8  ;;  %v1309_v56 = vadd.f32 %v1308_v51, %v1307_v26  ;;  %v677_v38 = vadd.f32 %v2203_v9, %v676_v34 }
 0x217   : > { %v1312_v57 = vsel %vm481_vm0, %v1260_v54, 0.0 }
 0x218   : > { %v1445_v13 = vsel %vm1444_vm7, %v1426_v55, %v1443_v45  ;;  %v1310_v58 = vrot.slane %v1309_v56, 1  ;;  %v1313_v30 = vrot.slane %v1312_v57, 4 }
 0x21a   : > { %v1311_v59 = vadd.f32 %v1310_v58, %v1309_v56  ;;  %v1314_v60 = vadd.f32 %v1313_v30, %v1312_v57 }
 0x21c   : > { %v1387_v61 = vpack.c.bf16 %v1311_v59, %v1311_v59  ;;  %v1315_v62 = vrot.slane %v1314_v60, 2  ;;  %v1231_v0 = vpop.f32.mrf.mxu0 }
 0x21d   : > { %v1261_v2 = vmul.f32 %v1231_v0, %v664_v49  ;;  %v678_v12 = vpop.f32.mrf.mxu2 }
 0x21e   : > { %v1427_v7 = vunpack.c.l.b16 %v1387_v61  ;;  %v1316_v3 = vadd.f32 %v1315_v62, %v1314_v60  ;;  %v679_v8 = vadd.f32 %v2203_v9, %v678_v12 }
 0x21f   : > { %v1319_v11 = vsel %vm481_vm0, %v1261_v2, 0.0 }
 0x220   : > { %v1317_v15 = vrot.slane %v1316_v3, 1  ;;  %v1320_v17 = vrot.slane %v1319_v11, 4  ;;  %v1447_v20 = vsel %vm1446_vm8, %v1427_v7, %v1445_v13 }
 0x222   : > { %v1318_v10 = vadd.f32 %v1317_v15, %v1316_v3  ;;  %v1321_v21 = vadd.f32 %v1320_v17, %v1319_v11 }
 0x224   : > { %v1388_v52 = vpack.c.bf16 %v1318_v10, %v1318_v10  ;;  %v1322_v5 = vrot.slane %v1321_v21, 2  ;;  %v1234_v16 = vpop.f32.mrf.mxu0 }
 0x225   : > { %v1262_v43 = vmul.f32 %v1234_v16, %v667_v19  ;;  %v681_v13 = vpop.f32.mrf.mxu2 }
 0x226   : > { %v1428_v22 = vunpack.c.l.b16 %v1388_v52  ;;  %v1323_v4 = vadd.f32 %v1322_v5, %v1321_v21  ;;  %v682_v62 = vadd.f32 %v2203_v9, %v681_v13 }
 0x227   : > { %v1326_v47 = vsel %vm481_vm0, %v1262_v43, 0.0 }
 0x228   : > { %v1324_v14 = vrot.slane %v1323_v4, 1  ;;  %v1449_v24 = vsel %vm1448_vm9, %v1428_v22, %v1447_v20  ;;  %v1327_v51 = vrot.slane %v1326_v47, 4 }
 0x22a   : > { %v1325_v25 = vadd.f32 %v1324_v14, %v1323_v4  ;;  %v1328_v59 = vadd.f32 %v1327_v51, %v1326_v47 }
 0x22c   : > { %v1389_v6 = vpack.c.bf16 %v1325_v25, %v1325_v25  ;;  %v1236_v27 = vpop.f32.mrf.mxu0  ;;  %v1329_v7 = vrot.slane %v1328_v59, 2 }
 0x22d   : > { %v1263_v23 = vmul.f32 %v1236_v27, %v669_v37  ;;  %v683_v16 = vpop.f32.mrf.mxu2 }
 0x22e   : > { %v1429_v28 = vunpack.c.l.b16 %v1389_v6  ;;  %v1330_v52 = vadd.f32 %v1329_v7, %v1328_v59  ;;  %v684_v6 = vadd.f32 %v2203_v9, %v683_v16 }
 0x22f   : > { %v1333_v45 = vsel %vm481_vm0, %v1263_v23, 0.0 }
 0x230   : > { %v2234_v31 = vsel %vm1450_vm10, %v1429_v28, %v1449_v24  ;;  %v1334_v50 = vrot.slane %v1333_v45, 4  ;;  %v1331_v27 = vrot.slane %v1330_v52, 1 }
 0x232   : > { %v1335_v57 = vadd.f32 %v1334_v50, %v1333_v45 }
 0x234   : > { %v1239_v32 = vpop.f32.mrf.mxu0  ;;  %v1336_v0 = vrot.slane %v1335_v57, 2 }
 0x235   : > { %v1264_v40 = vmul.f32 %v1239_v32, %v672_v36 }
 0x236   : > { %v1337_v18 = vadd.f32 %v1336_v0, %v1335_v57 }
 0x237   : > { %v1340_v46 = vsel %vm481_vm0, %v1264_v40, 0.0 }
 0x238   : > { %v1341_v42 = vrot.slane %v1340_v46, 4  ;;  %v1338_v63 = vrot.slane %v1337_v18, 1 }
 0x23a   : > { %v1342_v58 = vadd.f32 %v1341_v42, %v1340_v46  ;;  %v1339_v36 = vadd.f32 %v1338_v63, %v1337_v18 }
 0x23c   : > { %v1241_v35 = vpop.f32.mrf.mxu0  ;;  %v1343_v2 = vrot.slane %v1342_v58, 2 }
 0x23d   : > { %v1265_v44 = vmul.f32 %v1241_v35, %v674_v39  ;;  %v1332_v39 = vadd.f32 %v1331_v27, %v1330_v52 }
 0x23e   : > { %v1344_v10 = vadd.f32 %v1343_v2, %v1342_v58 }
 0x23f   : > { %v1347_v48 = vsel %vm481_vm0, %v1265_v44, 0.0  ;;  %v1391_v44 = vpack.c.bf16 %v1339_v36, %v1339_v36  ;;  %v1390_v47 = vpack.c.bf16 %v1332_v39, %v1332_v39 }
 0x240   : > { %v1348_v53 = vrot.slane %v1347_v48, 4  ;;  %v1345_v25 = vrot.slane %v1344_v10, 1 }
 0x241   : > { %v1431_v42 = vunpack.c.l.b16 %v1391_v44 }
 0x242   : > { %v1349_v60 = vadd.f32 %v1348_v53, %v1347_v48 }
 0x244   : > { %v1244_v41 = vpop.f32.mrf.mxu0  ;;  %v1350_v3 = vrot.slane %v1349_v60, 2 }
 0x245   : > { %v1266_v33 = vmul.f32 %v1244_v41, %v677_v38  ;;  %v1346_v38 = vadd.f32 %v1345_v25, %v1344_v10 }
 0x246   : > { %v1351_v5 = vadd.f32 %v1350_v3, %v1349_v60 }
 0x247   : > { %v1354_v26 = vsel %vm481_vm0, %v1266_v33, 0.0  ;;  %v1392_v45 = vpack.c.bf16 %v1346_v38, %v1346_v38 }
 0x248   : > { %v1355_v55 = vrot.slane %v1354_v26, 4  ;;  %v1352_v28 = vrot.slane %v1351_v5, 1 }
 0x249   : > { %v1432_v53 = vunpack.c.l.b16 %v1392_v45 }
 0x24a   : > { %v1356_v61 = vadd.f32 %v1355_v55, %v1354_v26  ;;  %v1353_v40 = vadd.f32 %v1352_v28, %v1351_v5  ;;  %v1430_v55 = vunpack.c.l.b16 %v1390_v47 }
 0x24c   : > { %v1246_v54 = vpop.f32.mrf.mxu0  ;;  %v1357_v15 = vrot.slane %v1356_v61, 2  ;;  %v1393_v48 = vpack.c.bf16 %v1353_v40, %v1353_v40  ;;  %v1452_v58 = vsel %vm1438_vm4, %v1431_v42, %v1430_v55 }
 0x24d   : > { %v1267_v56 = vmul.f32 %v1246_v54, %v679_v8  ;;  %v1453_v60 = vsel %vm1440_vm5, %v1432_v53, %v1452_v58 }
 0x24e   : > { %v1358_v4 = vadd.f32 %v1357_v15, %v1356_v61  ;;  %v1759_v15 = vld [vmem:[%s2307_s9] ss:$0 sm:$0xff] }
 0x24f   : > { %v1361_v30 = vsel %vm481_vm0, %v1267_v56, 0.0  ;;  %v1433_v56 = vunpack.c.l.b16 %v1393_v48 }
 0x250   : > { %v1362_v49 = vrot.slane %v1361_v30, 4  ;;  %v1359_v34 = vrot.slane %v1358_v4, 1 }
 0x251   : > { %v1454_v61 = vsel %vm1442_vm6, %v1433_v56, %v1453_v60 }
 0x252   : > { %v1363_v1 = vadd.f32 %v1362_v49, %v1361_v30  ;;  %v1360_v43 = vadd.f32 %v1359_v34, %v1358_v4 }
 0x254   : > { %v1249_v11 = vpop.f32.mrf.mxu0  ;;  %v1364_v20 = vrot.slane %v1363_v1, 2  ;;  %v1394_v26 = vpack.c.bf16 %v1360_v43, %v1360_v43 }
 0x255   : > { %v1268_v17 = vmul.f32 %v1249_v11, %v682_v62 }
 0x256   : > { %v1365_v14 = vadd.f32 %v1364_v20, %v1363_v1  ;;  %v1434_v13 = vunpack.c.l.b16 %v1394_v26 }
 0x257   : > { %v1368_v21 = vsel %vm481_vm0, %v1268_v17, 0.0 }
 0x258   : > { %v1369_v22 = vrot.slane %v1368_v21, 4  ;;  %v1366_v19 = vrot.slane %v1365_v14, 1  ;;  %v1455_v0 = vsel %vm1444_vm7, %v1434_v13, %v1454_v61 }
 0x25a   : > { %v1370_v24 = vadd.f32 %v1369_v22, %v1368_v21  ;;  %v1367_v33 = vadd.f32 %v1366_v19, %v1365_v14 }
 0x25c   : > { %v1371_v29 = vrot.slane %v1370_v24, 2  ;;  %v1251_v32 = vpop.f32.mrf.mxu0  ;;  %v1395_v8 = vpack.c.bf16 %v1367_v33, %v1367_v33 }
 0x25d   : > { %v1269_v35 = vmul.f32 %v1251_v32, %v684_v6 }
 0x25e   : > { %v1372_v37 = vadd.f32 %v1371_v29, %v1370_v24  ;;  %v1435_v30 = vunpack.c.l.b16 %v1395_v8 }
 0x25f   : > { %v1375_v23 = vsel %vm481_vm0, %v1269_v35, 0.0 }
 0x260   : > { %v1373_v12 = vrot.slane %v1372_v37, 1  ;;  %v1376_v41 = vrot.slane %v1375_v23, 4  ;;  %v1456_v2 = vsel %vm1446_vm8, %v1435_v30, %v1455_v0 }
 0x262   : > { %v1377_v9 = vadd.f32 %v1376_v41, %v1375_v23  ;;  %v1374_v46 = vadd.f32 %v1373_v12, %v1372_v37 }
 0x264   : > { %v1378_v50 = vrot.slane %v1377_v9, 2  ;;  %v1396_v54 = vpack.c.bf16 %v1374_v46, %v1374_v46 }
 0x266   : > { %v1379_v51 = vadd.f32 %v1378_v50, %v1377_v9  ;;  %v1436_v49 = vunpack.c.l.b16 %v1396_v54 }
 0x268   : > { %v1380_v57 = vrot.slane %v1379_v51, 1  ;;  %v1457_v7 = vsel %vm1448_vm9, %v1436_v49, %v1456_v2 }
 0x26a   : > { %v1381_v59 = vadd.f32 %v1380_v57, %v1379_v51 }
 0x26c   : > { %v1397_v62 = vpack.c.bf16 %v1381_v59, %v1381_v59 }
 0x26e   : > { %v1437_v1 = vunpack.c.l.b16 %v1397_v62 }
 0x270   : > { %v1458_v3 = vsel %vm1450_vm10, %v1437_v1, %v1457_v7 }
 0x271   : > { %v1459_v11 = vpack.c.b16 %v1458_v3, %v2234_v31 }
 0x273   : > { %1691 = vmatmul.msk.bf16.vlgmr.msrb.gmra.mxu1 %vm481_vm0, %v1459_v11 }
 0x2f0   : > { %v1484_v17 = vpop.f32.mrf.mxu1 }
 0x2f1   : > { %v1485_v18 = vadd.f32 %v1759_v15, %v1484_v17 }
 0x2f3   : > { %1489 = vst.msk [vmem:[%s423_s17] sm:$0xff] %vm481_vm0, %v1485_v18 }
 0x2f8   : > { %v1486_v31 = vpop.f32.mrf.mxu1 }
 0x2f9   : > { %v1487_v20 = vadd.f32 %v1759_v15, %v1486_v31 }
 0x2fb   : > { %1490 = vst.msk [vmem:[%s423_s17 + $0x8] sm:$0xff] %vm481_vm0, %v1487_v20 }
 0x2fc   : > { %1851 = shalt.err (!%p1848_p4)
}
 0x2fd   : > { %s1888_s26 = smov 128   ;;  %s1889_s17 = smov 8  }
 0x2fe   : > { %1715 = dma.vmem_to_hbm [thread:$0]  (%p1990_p5), %s1505_s18, 256, %s1507_s25, %s1492_s4, %s1888_s26, %s1888_s26, %s1889_s17  }
 0x2ff PF: > { %p1721_p7 = scmp.ge.s32.totalorder %s1886_s24, 2  ;;  %s1521_s20 = sand.u32 1, %s1874_s21  }
 0x300   : > { %s1522_s28 = scalar_lea.sflag [#allocation3], %s1521_s20 }
 0x301   : > { %p1718_p8 = pnand %p1721_p7, %p1994_p6 }
 0x303   : > { %p1719_p9 = pneg %p1718_p8 }
 0x305   : > { %1869 = dma.done.wait (%p1719_p9), %s1522_s28, 256  }
 0x306   : > { %1871 = vsyncadd (%p1719_p9), %s1522_s28, 4294967040  ;;  %p22_p10 = scmp.ge.s32.totalorder %s1978_s27, 4   ;;  %s2317_s21 = smov %s1878_s22 }
 0x307   : > { %s2318_s22 = smov %s1882_s23  ;;  %s2319_s23 = smov %s1988_s30 }
 0x308   : > { %s2320_s24 = smov %s1978_s27  ;;  %24 = sbr.rel (!%p22_p10) target bundleno = 6 (0x6), region = 106 }
 0x30d   :  { %1528 = vsyncpa [#allocation3], 1 }
 0x30e   :  { %1530 = vsyncpa [#allocation3 + $0x1], 1 }

</bundles_post_ra>
